<compile_context>
chip_gen: v7x
topology: tpu7x:2x2x1
jax: 0.10.0
libtpu: 0.0.40
codegen_flags: <defaults>
</compile_context>

<pallas_src>
import numpy as np
import jax
import jax.numpy as jnp
from jax.experimental import pallas as pl
from jax.experimental.pallas import tpu as pltpu


# ----------------------------- Pallas kernel -------------------------------

def lseg_fused_kernel(p_ref, w_ref, b_ref, t_ref, wup_ref, o_ref):
    """Fused LSeg head + similarity + bilinear 2x upsample for one image.

    p_ref:   (1, P, patch_dim)  flattened image patches (P = Hp*Wp pixels)
    w_ref:   (patch_dim, C)     bf16, fused (patch_embed @ head1) weight
    b_ref:   (1, C)             f32,  fused bias
    t_ref:   (L, C)             bf16, logit_scale * L2-normalized text feats
    wup_ref: (P, 4P)            f32,  kron(Wr, Wc)^T bilinear upsample weight
    o_ref:   (1, L, 4P)         f32,  upsampled logits (labels, 2Hp*2Wp)
    """
    patches = p_ref[0].astype(jnp.bfloat16)                         # (P, pd)
    # backbone stand-in + scratch.head1, fused into one bf16 MXU matmul
    feat = jnp.dot(patches, w_ref[...],
                   preferred_element_type=jnp.float32) + b_ref[...]  # (P, C)
    # per-pixel L2 normalization of image features (fp32)
    img = feat * jax.lax.rsqrt(jnp.sum(feat * feat, axis=-1, keepdims=True))
    # similarity, transposed to (labels, pixels): lane dim = pixels (dense)
    logits = jnp.einsum('lc,pc->lp', t_ref[...], img.astype(jnp.bfloat16),
                        preferred_element_type=jnp.float32)          # (L, P)
    # bilinear 2x upsample (align_corners=True) as a single matmul;
    # output last dim = 4P (multiple of 128) -> unmasked lane-dense stores
    o_ref[0] = jnp.dot(logits, wup_ref[...],
                       preferred_element_type=jnp.float32)           # (L, 4P)


# ------------------------------ host wrapper --------------------------------

def _bilinear_matrix(out_size, in_size):
    """Row-interp matrix for bilinear resize with align_corners=True (numpy)."""
    s = np.arange(out_size, dtype=np.float64) * (in_size - 1) / (out_size - 1)
    lo = np.clip(np.floor(s).astype(np.int64), 0, in_size - 2)
    frac = s - lo
    w = np.zeros((out_size, in_size), dtype=np.float32)
    w[np.arange(out_size), lo] = (1.0 - frac).astype(np.float32)
    w[np.arange(out_size), lo + 1] = frac.astype(np.float32)
    return w


class LSegModulePallas:
    """Synthetic, deterministic-weight LSeg head with a fused Pallas kernel."""

    def __init__(self, num_features=32, out_c=128, patch=2, num_labels=20):
        self.patch = patch
        self.num_features = num_features
        self.out_c = out_c
        self.num_labels = num_labels

        key = jax.random.PRNGKey(0)
        k1, k2, k3, k4, k5 = jax.random.split(key, 5)
        patch_dim = 3 * patch * patch
        w_embed = jax.random.normal(k1, (patch_dim, num_features),
                                    jnp.float32) * 0.1
        b_embed = jax.random.normal(k2, (1, num_features), jnp.float32) * 0.01
        w_head = jax.random.normal(k3, (num_features, out_c),
                                   jnp.float32) * 0.1
        b_head = jax.random.normal(k4, (1, out_c), jnp.float32) * 0.01
        text_feat = jax.random.normal(k5, (num_labels, out_c), jnp.float32)
        logit_scale = np.float32(np.log(1.0 / 0.07))

        # Host-side fusion (exact in fp32): patch-embed + head1 -> one matmul.
        w_comb = w_embed @ w_head                       # (patch_dim, out_c)
        b_comb = b_embed @ w_head + b_head              # (1, out_c)
        self.w_comb_bf16 = w_comb.astype(jnp.bfloat16)  # bf16-native MXU
        self.b_comb = b_comb                            # keep bias in fp32

        # Text features: L2-normalize and fold logit_scale in fp32 ONCE,
        # then cast to bf16 (PyTorch uses .half() for the similarity matmul).
        txt = text_feat * jax.lax.rsqrt(
            jnp.sum(text_feat * text_feat, axis=-1, keepdims=True))
        self.txt_bf16 = (logit_scale * txt).astype(jnp.bfloat16)

    # --------------------------------------------------------------------- #
    def _upsample_weight(self, hp, wp):
        # kron(Wr, Wc)[oh*2Wp+ow, h*Wp+w] = Wr[oh,h] * Wc[ow,w]; transposed so
        # the kernel does logits(L,P) @ wup_t(P,4P).  Fine while 4*(Hp*Wp)^2
        # fp32 stays small; very large maps would need the separable form.
        wup = np.kron(_bilinear_matrix(2 * hp, hp),
                      _bilinear_matrix(2 * wp, wp))      # (4P, P)
        return jnp.asarray(np.ascontiguousarray(wup.T))  # (P, 4P)

    # --------------------------------------------------------------------- #
    def _extract_patches(self, x):
        b, c, h, w = x.shape
        p = self.patch
        hp, wp = h // p, w // p
        patches = x.reshape(b, c, hp, p, wp, p)
        patches = jnp.transpose(patches, (0, 2, 4, 1, 3, 5))  # B,Hp,Wp,C,p,p
        return patches.reshape(b, hp * wp, c * p * p)

    # --------------------------------------------------------------------- #
    def __call__(self, x):
        """x: (B, 3, H, W) NCHW fp32 -> (B, num_labels, H, W) fp32."""
        b, c, h, w = x.shape
        p = self.patch
        assert c == 3 and h % p == 0 and w % p == 0
        hp, wp = h // p, w // p
        npix = hp * wp
        patch_dim = c * p * p
        L, C = self.num_labels, self.out_c

        patches = self._extract_patches(x)               # (B, P, patch_dim)
        wup_t = self._upsample_weight(hp, wp)            # (P, 4P)

        const2d = lambda i: (0, 0)                       # broadcast params
        out = pl.pallas_call(
            lseg_fused_kernel,
            out_shape=jax.ShapeDtypeStruct((b, L, 4 * npix), jnp.float32),
            grid_spec=pl.GridSpec(
                grid=(b,),                               # >=2 steps: both TCs
                in_specs=[
                    pl.BlockSpec((1, npix, patch_dim), lambda i: (i, 0, 0)),
                    pl.BlockSpec((patch_dim, C), const2d),
                    pl.BlockSpec((1, C), const2d),
                    pl.BlockSpec((L, C), const2d),
                    pl.BlockSpec((npix, 4 * npix), const2d),
                ],
                out_specs=pl.BlockSpec((1, L, 4 * npix), lambda i: (i, 0, 0)),
            ),
            compiler_params=pltpu.CompilerParams(
                dimension_semantics=("parallel",)),
        )(patches, self.w_comb_bf16, self.b_comb, self.txt_bf16, wup_t)

        # (B, L, 2Hp*2Wp) -> NCHW
        return out.reshape(b, L, 2 * hp, 2 * wp)

    # Pure-JAX reference of the same synthetic forward (sanity check).
    def reference(self, x):
        b, c, h, w = x.shape
        hp, wp = h // self.patch, w // self.patch
        patches = self._extract_patches(x)
        feat = jnp.einsum('bpk,kc->bpc', patches.astype(jnp.bfloat16),
                          self.w_comb_bf16,
                          preferred_element_type=jnp.float32) + self.b_comb
        img = feat * jax.lax.rsqrt(
            jnp.sum(feat * feat, axis=-1, keepdims=True))
        logits = jnp.einsum('lc,bpc->blp', self.txt_bf16,
                            img.astype(jnp.bfloat16),
                            preferred_element_type=jnp.float32)
        wup_t = self._upsample_weight(hp, wp)
        up = jnp.einsum('blp,pq->blq', logits, wup_t)
        return up.reshape(b, self.num_labels, h, w)


if __name__ == "__main__":
    module = LSegModulePallas(num_features=32, out_c=128, patch=2,
                              num_labels=20)
    key = jax.random.PRNGKey(0)
    x = jax.random.normal(key, (2, 3, 32, 32), jnp.float32)   # NCHW input

    out = jax.block_until_ready(module(x))
    assert out.shape == (2, 20, 32, 32), out.shape
    assert out.dtype == jnp.float32

    ref = jax.block_until_ready(module.reference(x))
    np.testing.assert_allclose(np.asarray(out), np.asarray(ref),
                               rtol=2e-2, atol=2e-2)
    print("KERNEL_OK")
</pallas_src>

<mosaic_0001>
module attributes {stable_mosaic.version = 11 : i64} {
  func.func @lseg_fused_kernel(%arg0: i32, %arg1: memref<1x256x12xf32, #tpu.memory_space<vmem>>, %arg2: memref<12x128xbf16, #tpu.memory_space<vmem>>, %arg3: memref<1x128xf32, #tpu.memory_space<vmem>>, %arg4: memref<20x128xbf16, #tpu.memory_space<vmem>>, %arg5: memref<256x1024xf32, #tpu.memory_space<vmem>>, %arg6: memref<1x20x1024xf32, #tpu.memory_space<vmem>>) attributes {dimension_semantics = [#tpu.dimension_semantics<parallel>], iteration_bounds = array<i64: 2>, scalar_prefetch = 0 : i64, scratch_operands = 0 : i64, tpu.core_type = #tpu.core_type<tc>, window_params = [{transform_indices = @transform_0, window_bounds = array<i64: 1, 256, 12>}, {pipeline_mode = #tpu.pipeline_mode<synchronous>, transform_indices = @transform_1, window_bounds = array<i64: 12, 128>}, {pipeline_mode = #tpu.pipeline_mode<synchronous>, transform_indices = @transform_2, window_bounds = array<i64: 1, 128>}, {pipeline_mode = #tpu.pipeline_mode<synchronous>, transform_indices = @transform_3, window_bounds = array<i64: 20, 128>}, {pipeline_mode = #tpu.pipeline_mode<synchronous>, transform_indices = @transform_4, window_bounds = array<i64: 256, 1024>}, {transform_indices = @transform_5, window_bounds = array<i64: 1, 20, 1024>}]} {
    %c0 = arith.constant 0 : index
    %c0_0 = arith.constant 0 : index
    %c0_1 = arith.constant 0 : index
    %0 = vector.load %arg1[%c0, %c0_0, %c0_1] : memref<1x256x12xf32, #tpu.memory_space<vmem>>, vector<1x256x12xf32>
    %1 = vector.shape_cast %0 : vector<1x256x12xf32> to vector<256x12xf32>
    %2 = arith.truncf %1 : vector<256x12xf32> to vector<256x12xbf16>
    %c0_2 = arith.constant 0 : index
    %c0_3 = arith.constant 0 : index
    %3 = vector.load %arg2[%c0_2, %c0_3] : memref<12x128xbf16, #tpu.memory_space<vmem>>, vector<12x128xbf16>
    %cst = arith.constant dense<0.000000e+00> : vector<256x128xf32>
    %4 = tpu.matmul %2, %3, %cst {dimension_numbers = #tpu.dot_dimension_numbers<[1], [0], [0], [1], [0, 0, 1, 1], [], []>} : vector<256x12xbf16>, vector<12x128xbf16>, vector<256x128xf32> -> vector<256x128xf32>
    %c0_4 = arith.constant 0 : index
    %c0_5 = arith.constant 0 : index
    %5 = vector.load %arg3[%c0_4, %c0_5] : memref<1x128xf32, #tpu.memory_space<vmem>>, vector<1x128xf32>
    %6 = vector.broadcast %5 : vector<1x128xf32> to vector<256x128xf32>
    %7 = arith.addf %4, %6 : vector<256x128xf32>
    %8 = arith.mulf %7, %7 : vector<256x128xf32>
    %cst_6 = arith.constant dense<0.000000e+00> : vector<256xf32>
    %9 = vector.multi_reduction <add>, %8, %cst_6 [1] : vector<256x128xf32> to vector<256xf32>
    %10 = vector.shape_cast %9 : vector<256xf32> to vector<256x1xf32>
    %11 = math.rsqrt %10 : vector<256x1xf32>
    %12 = vector.broadcast %11 : vector<256x1xf32> to vector<256x128xf32>
    %13 = arith.mulf %7, %12 : vector<256x128xf32>
    %c0_7 = arith.constant 0 : index
    %c0_8 = arith.constant 0 : index
    %14 = vector.load %arg4[%c0_7, %c0_8] : memref<20x128xbf16, #tpu.memory_space<vmem>>, vector<20x128xbf16>
    %15 = arith.truncf %13 : vector<256x128xf32> to vector<256x128xbf16>
    "tpu.trace_start"() <{level = 10 : i32, message = "lc,pc->lp"}> : () -> ()
    %cst_9 = arith.constant dense<0.000000e+00> : vector<20x256xf32>
    %16 = tpu.matmul %14, %15, %cst_9 {dimension_numbers = #tpu.dot_dimension_numbers<[1], [1], [0], [0], [0, 0, 1, 0], [], []>} : vector<20x128xbf16>, vector<256x128xbf16>, vector<20x256xf32> -> vector<20x256xf32>
    "tpu.trace_stop"() : () -> ()
    %c0_10 = arith.constant 0 : index
    %c0_11 = arith.constant 0 : index
    %17 = vector.load %arg5[%c0_10, %c0_11] : memref<256x1024xf32, #tpu.memory_space<vmem>>, vector<256x1024xf32>
    %cst_12 = arith.constant dense<0.000000e+00> : vector<20x1024xf32>
    %18 = tpu.matmul %16, %17, %cst_12 {dimension_numbers = #tpu.dot_dimension_numbers<[1], [0], [0], [1], [0, 0, 1, 1], [], []>} : vector<20x256xf32>, vector<256x1024xf32>, vector<20x1024xf32> -> vector<20x1024xf32>
    %c0_13 = arith.constant 0 : index
    %c0_14 = arith.constant 0 : index
    %c0_15 = arith.constant 0 : index
    %19 = vector.load %arg6[%c0_13, %c0_14, %c0_15] : memref<1x20x1024xf32, #tpu.memory_space<vmem>>, vector<1x20x1024xf32>
    %20 = vector.shape_cast %19 : vector<1x20x1024xf32> to vector<20x1024xf32>
    %21 = vector.shape_cast %18 : vector<20x1024xf32> to vector<1x20x1024xf32>
    tpu.vector_store %arg6[%c0_13, %c0_14, %c0_15], %21 {strides = array<i32>} : memref<1x20x1024xf32, #tpu.memory_space<vmem>>, vector<1x20x1024xf32>,
    return
  }
  func.func @transform_0(%arg0: i32) -> (i32, i32, i32) {
    %c0_i32 = arith.constant 0 : i32
    %c0_i32_0 = arith.constant 0 : i32
    %c0_i32_1 = arith.constant 0 : i32
    return %arg0, %c0_i32, %c0_i32_0 : i32, i32, i32
  }
  func.func @transform_1(%arg0: i32) -> (i32, i32) {
    %c0_i32 = arith.constant 0 : i32
    %c0_i32_0 = arith.constant 0 : i32
    %c0_i32_1 = arith.constant 0 : i32
    return %c0_i32, %c0_i32_0 : i32, i32
  }
  func.func @transform_2(%arg0: i32) -> (i32, i32) {
    %c0_i32 = arith.constant 0 : i32
    %c0_i32_0 = arith.constant 0 : i32
    %c0_i32_1 = arith.constant 0 : i32
    return %c0_i32, %c0_i32_0 : i32, i32
  }
  func.func @transform_3(%arg0: i32) -> (i32, i32) {
    %c0_i32 = arith.constant 0 : i32
    %c0_i32_0 = arith.constant 0 : i32
    %c0_i32_1 = arith.constant 0 : i32
    return %c0_i32, %c0_i32_0 : i32, i32
  }
  func.func @transform_4(%arg0: i32) -> (i32, i32) {
    %c0_i32 = arith.constant 0 : i32
    %c0_i32_0 = arith.constant 0 : i32
    %c0_i32_1 = arith.constant 0 : i32
    return %c0_i32, %c0_i32_0 : i32, i32
  }
  func.func @transform_5(%arg0: i32) -> (i32, i32, i32) {
    %c0_i32 = arith.constant 0 : i32
    %c0_i32_0 = arith.constant 0 : i32
    %c0_i32_1 = arith.constant 0 : i32
    return %arg0, %c0_i32, %c0_i32_0 : i32, i32, i32
  }
}

</mosaic_0001>

<bundles_post_ra>
// kernel: tpu_custom_call.1
= control target key start
LH: loop header
LB: loop body
LE: loop exit
PB: predicated region body
PF: predicated region fallthrough
CT: control target
= control target key end

     0   :  { %10 = vsyncpa [#allocation3], 0  ;;  %s1991_s18 = smov 0   ;;  %s2495_s0 = inlined_call_operand.vmem [shape: f32[2,256,12], index: 0, kind: input, shape index: {}]   ;;  %s2496_s1 = inlined_call_operand.vmem [shape: bf16[12,128], index: 1, kind: input, shape index: {}]   ;;  %s2497_s2 = inlined_call_operand.vmem [shape: f32[1,128], index: 2, kind: input, shape index: {}]   ;;  %s2498_s3 = inlined_call_operand.vmem [shape: bf16[20,128], index: 3, kind: input, shape index: {}]   ;;  %s2499_s4 = inlined_call_operand.hbm [shape: f32[256,1024], index: 4, kind: input, shape index: {}]   ;;  %s2500_s5 = inlined_call_operand.vmem [shape: f32[2,20,1024], index: 5, kind: output, shape index: {}]  }
   0x1 LB: > { %s1997_s19 = sadd.s32 4294967295, %s1956_s18   ;;  %p1438_p0 = scmp.ge.s32.totalorder %s1956_s18, 1  ;;  %s1956_s18 = sphi %s1991_s18, %s16_s18  }
   0x2   : > { %p157_p1 = scmp.lt.s32.totalorder %s1956_s18, 3  ;;  %s1958_s20 = smov [#allocation2]  }
   0x3   : > { %s178_s21 = sshll.u32 %s1958_s20, 4  ;;  %p2501_p3 = scmp.eq.s32.totalorder %s1997_s19, 0  ;;  %s179_s21 = int_to_ptr.vmem [resolvable:$true] %s178_s21 }
   0x4   : > { %p2001_p2 = pnand %p1438_p0, %p157_p1  ;;  %s1918_s26 = scalar_lea.hbm %s2499_s4, 32768 }
   0x5   : > { %p1919_p6 = scmp.ne.s32.totalorder %s2499_s4, %s1918_s26  ;;  %p1925_p10 = scmp.lt.u32.totalorder %s1918_s26, %s2499_s4 }
   0x6   : > { %s2503_s22 = scalar_select %p2001_p2, 1, 0 }
   0x7   : > { %p1834_p4 = pneg %p2001_p2 }
   0x9   : > { %p2010_p5 = pnand %p2501_p3, %p1834_p4 }
   0xb   : > { %p1920_p7 = pneg %p2010_p5 }
   0xd   : > { %p1921_p8 = pnand %p1920_p7, %p1919_p6 }
   0xf   : > { %p1922_p9 = pneg %p1921_p8 }
  0x11   : > { %p1927_p11 = pnand %p1925_p10, %p1922_p9 }
  0x13   : > { %1930 = shalt.err (!%p1927_p11)
}
  0x14   : > { %s1931_s6 = scalar_lea.vmem %s179_s21, 32768  ;;  %p1939_p1 = scmp.lt.s32.totalorder %s179_s21, %s179_s21 }
  0x15   : > { %p1932_p12 = scmp.ne.s32.totalorder %s179_s21, %s1931_s6  ;;  %p1940_p4 = scmp.lt.s32.totalorder %s1931_s6, %s1931_s6 }
  0x17   : > { %p1934_p13 = pnand %p1932_p12, %p1920_p7  ;;  %p1941_p3 = por %p1940_p4, %p1939_p1 }
  0x19   : > { %p1935_p0 = pneg %p1934_p13 }
  0x1b   : > { %p1942_p2 = pnand %p1941_p3, %p1935_p0 }
  0x1d   : > { %1945 = shalt.err (!%p1942_p2)
}
  0x1e   : > { %s1959_s7 = smov 1024   ;;  %s1960_s8 = smov 64  }
  0x1f   : > { %1837 = dma.hbm_to_vmem [thread:$0]  (!%p2010_p5), %s2499_s4, 32768, %s179_s21, [#allocation3], %s1959_s7, %s1959_s7, %s1960_s8  }
  0x20   : > { %p2505_p6 = scmp.ne.s32.totalorder %s2503_s22, 0 }
  0x21   : > { %p2506_p8 = scmp.eq.s32.totalorder (!%p2505_p6), %s1997_s19, 0 }
  0x22   : > { %202 = sbr.rel (%p2505_p6) target bundleno = 1081 (0x439), region = 40 }
  0x29   : > { %1951 = dma.done.wait (%p2506_p8), [#allocation3], 32768   ;;  %p2507_p7 = pmov %p2506_p8 }
  0x2a   : > { %p230_p2 = scmp.lt.s32.totalorder %s1997_s19, 1  ;;  %vm352_vm0 = vcmask 1045504   ;;  %v1851_v0 = vld [vmem:[%s2496_s1] sm:$0x3f]   ;;  %vm303_vm1 = vcmask 97280  }
  0x2b   : > { %1953 = vsyncadd (%p2507_p7), [#allocation3], 4294934528  ;;  %1828 = vmatprep.subr.msk.bf16.mxu0 %vm352_vm0, %v1851_v0  ;;  %v354_v4 = vsel %vm352_vm0, %v1851_v0, 0  ;;  %v2100_v50 = vld [vmem:[%s2497_s2] ss:$0 sm:$0xff] }
  0x2c   : > { %s2509_s19 = smov (!%p230_p2, %s1997_s19), 1  ;;  %1507 = vmatpush3.bf16.msra.mxu0 %v354_v4 }
  0x2d   : > { %s1468_s11 = sshll.u32 %s2509_s19, 8  ;;  %s1829_s25 = smul.u32 192, %s2509_s19 }
  0x2e   : > { %s2044_s14 = scalar_lea.vmem %s2495_s0, %s1468_s11 }
  0x2f   : > { %v241_v1 = vld [vmem:[%s2044_s14] sm:$0xff]  ;;  %v242_v2 = vld [vmem:[%s2044_s14 + $0x8] sm:$0xff]  ;;  %v243_v3 = vld [vmem:[%s2044_s14 + $0x10] sm:$0xff]  ;;  %s2466_s28 = scalar_lea.vmem %s2500_s5, %s1829_s25 }
  0x30   : > { %v273_v5 = vpack.c.bf16 %v242_v2, %v241_v1  ;;  %v244_v6 = vld [vmem:[%s2044_s14 + $0x18] sm:$0xff]  ;;  %v245_v7 = vld [vmem:[%s2044_s14 + $0x20] sm:$0xff]  ;;  %v246_v8 = vld [vmem:[%s2044_s14 + $0x28] sm:$0xff] }
  0x31   : > { %v274_v9 = vpack.c.bf16 %v244_v6, %v243_v3  ;;  %v275_v10 = vpack.c.bf16 %v246_v8, %v245_v7  ;;  %v247_v11 = vld [vmem:[%s2044_s14 + $0x30] sm:$0xff]  ;;  %v248_v12 = vld [vmem:[%s2044_s14 + $0x38] sm:$0xff]  ;;  %v249_v13 = vld [vmem:[%s2044_s14 + $0x40] sm:$0xff] }
  0x32   : > { %1508 = vmatprep.mubr.msk.bf16.mxu0 %vm303_vm1, %v273_v5  ;;  %v250_v14 = vld [vmem:[%s2044_s14 + $0x48] sm:$0xff]  ;;  %v276_v15 = vpack.c.bf16 %v248_v12, %v247_v11  ;;  %v251_v17 = vld [vmem:[%s2044_s14 + $0x50] sm:$0xff]  ;;  %v252_v18 = vld [vmem:[%s2044_s14 + $0x58] sm:$0xff] }
  0x33   : > { %1509 = vmatmul.mubr.msk.bf16.vlgmr.msra.gmra.mrb[0].mxu0 %vm303_vm1, %v274_v9  ;;  %v277_v16 = vpack.c.bf16 %v250_v14, %v249_v13  ;;  %v253_v19 = vld [vmem:[%s2044_s14 + $0x60] sm:$0xff]  ;;  %v254_v20 = vld [vmem:[%s2044_s14 + $0x68] sm:$0xff]  ;;  %v278_v21 = vpack.c.bf16 %v252_v18, %v251_v17  ;;  %v255_v23 = vld [vmem:[%s2044_s14 + $0x70] sm:$0xff] }
  0x34   : > { %1512 = vmatprep.mubr.msk.bf16.mxu0 %vm303_vm1, %v275_v10  ;;  %v279_v22 = vpack.c.bf16 %v254_v20, %v253_v19  ;;  %v256_v24 = vld [vmem:[%s2044_s14 + $0x78] sm:$0xff]  ;;  %v257_v25 = vld [vmem:[%s2044_s14 + $0x80] sm:$0xff]  ;;  %v258_v26 = vld [vmem:[%s2044_s14 + $0x88] sm:$0xff] }
  0x35   : > { %v280_v27 = vpack.c.bf16 %v256_v24, %v255_v23  ;;  %v281_v28 = vpack.c.bf16 %v258_v26, %v257_v25  ;;  %v259_v29 = vld [vmem:[%s2044_s14 + $0x90] sm:$0xff]  ;;  %v260_v30 = vld [vmem:[%s2044_s14 + $0x98] sm:$0xff]  ;;  %v261_v31 = vld [vmem:[%s2044_s14 + $0xa0] sm:$0xff] }
  0x36   : > { %v262_v32 = vld [vmem:[%s2044_s14 + $0xa8] sm:$0xff]  ;;  %v282_v33 = vpack.c.bf16 %v260_v30, %v259_v29  ;;  %v263_v35 = vld [vmem:[%s2044_s14 + $0xb0] sm:$0xff]  ;;  %v264_v36 = vld [vmem:[%s2044_s14 + $0xb8] sm:$0xff] }
  0x37   : > { %v283_v34 = vpack.c.bf16 %v262_v32, %v261_v31  ;;  %v265_v37 = vld [vmem:[%s2044_s14 + $0xc0] sm:$0xff]  ;;  %v266_v38 = vld [vmem:[%s2044_s14 + $0xc8] sm:$0xff]  ;;  %v284_v39 = vpack.c.bf16 %v264_v36, %v263_v35  ;;  %v267_v41 = vld [vmem:[%s2044_s14 + $0xd0] sm:$0xff] }
  0x38   : > { %v285_v40 = vpack.c.bf16 %v266_v38, %v265_v37  ;;  %v268_v42 = vld [vmem:[%s2044_s14 + $0xd8] sm:$0xff]  ;;  %v269_v43 = vld [vmem:[%s2044_s14 + $0xe0] sm:$0xff]  ;;  %v270_v44 = vld [vmem:[%s2044_s14 + $0xe8] sm:$0xff] }
  0x39   : > { %v286_v45 = vpack.c.bf16 %v268_v42, %v267_v41  ;;  %v287_v46 = vpack.c.bf16 %v270_v44, %v269_v43  ;;  %v271_v47 = vld [vmem:[%s2044_s14 + $0xf0] sm:$0xff]  ;;  %v272_v48 = vld [vmem:[%s2044_s14 + $0xf8] sm:$0xff] }
  0x3a   : > { %v288_v49 = vpack.c.bf16 %v272_v48, %v271_v47 }
  0x3b   : > { %1513 = vmatmul.mubr.msk.bf16.gmra.mrb[4].mxu0 %vm303_vm1, %v276_v15 }
  0x3c   : > { %1516 = vmatprep.mubr.msk.bf16.mxu0 %vm303_vm1, %v277_v16 }
  0x43   : > { %1517 = vmatmul.mubr.msk.bf16.gmra.mrb[8].mxu0 %vm303_vm1, %v278_v21 }
  0x44   : > { %1520 = vmatprep.mubr.msk.bf16.mxu0 %vm303_vm1, %v279_v22 }
  0x4b   : > { %1521 = vmatmul.mubr.msk.bf16.gmra.mrb[12].mxu0 %vm303_vm1, %v280_v27 }
  0x4c   : > { %1524 = vmatprep.mubr.msk.bf16.mxu0 %vm303_vm1, %v281_v28 }
  0x53   : > { %1525 = vmatmul.mubr.msk.bf16.gmra.mrb[16].mxu0 %vm303_vm1, %v282_v33 }
  0x54   : > { %1528 = vmatprep.mubr.msk.bf16.mxu0 %vm303_vm1, %v283_v34 }
  0x5b   : > { %1529 = vmatmul.mubr.msk.bf16.gmra.mrb[20].mxu0 %vm303_vm1, %v284_v39 }
  0x5c   : > { %1532 = vmatprep.mubr.msk.bf16.mxu0 %vm303_vm1, %v285_v40 }
  0x63   : > { %1533 = vmatmul.mubr.msk.bf16.gmra.mrb[24].mxu0 %vm303_vm1, %v286_v45 }
  0x64   : > { %1536 = vmatprep.mubr.msk.bf16.mxu0 %vm303_vm1, %v287_v46 }
  0x6b   : > { %1537 = vmatmul.mubr.msk.bf16.gmra.mrb[28].mxu0 %vm303_vm1, %v288_v49 }
 0x106   : > { %v1510_v51 = vpop.f32.mrb[0].mxu0 }
 0x107   : > { %v390_v52 = vpop.f32.mrb[1].mxu0  ;;  %v2161_v31 = vadd.f32 %v1510_v51, %v2100_v50 }
 0x108   : > { %v2103_v53 = vadd.f32 %v2100_v50, %v390_v52  ;;  %v1511_v54 = vpop.f32.mrb[2].mxu0 }
 0x109   : > { %v393_v55 = vpop.f32.mrb[3].mxu0  ;;  %v2149_v22 = vadd.f32 %v1511_v54, %v2100_v50  ;;  %v519_v37 = vmul.f32 %v2161_v31, %v2161_v31 }
 0x10a   : > { %v2106_v56 = vadd.f32 %v2100_v50, %v393_v55  ;;  %v517_v57 = vmul.f32 %v2103_v53, %v2103_v53 }
 0x10b   : > { %v520_v28 = vmul.f32 %v2149_v22, %v2149_v22 }
 0x10c   : > { %549 = vadd.xlane.f32.xlu1 %v517_v57  ;;  %v518_v59 = vmul.f32 %v2106_v56, %v2106_v56 }
 0x10e   : > { %v2110_v58 = vpop.f32.mrb[4].mxu0 }
 0x10f   : > { %v406_v60 = vpop.f32.mrb[5].mxu0 }
 0x110   : > { %v1515_v61 = vpop.f32.mrb[6].mxu0  ;;  %551 = vadd.xlane.f32.xlu1 %v518_v59  ;;  %v2193_v47 = vadd.f32 %v2100_v50, %v406_v60 }
 0x111   : > { %v409_v62 = vpop.f32.mrb[7].mxu0  ;;  %v2198_v49 = vadd.f32 %v1515_v61, %v2100_v50 }
 0x112   : > { %v2169_v34 = vadd.f32 %v2100_v50, %v409_v62  ;;  %v521_v54 = vmul.f32 %v2193_v47, %v2193_v47 }
 0x113   : > { %v524_v61 = vmul.f32 %v2198_v49, %v2198_v49 }
 0x114   : > { %v522_v42 = vmul.f32 %v2169_v34, %v2169_v34 }
 0x116   : > { %v1518_v63 = vpop.f32.mrb[8].mxu0 }
 0x117   : > { %v2115_v0 = vadd.f32 %v1518_v63, %v2100_v50  ;;  %v422_v1 = vpop.f32.mrb[9].mxu0 }
 0x118   : > { %v2118_v2 = vadd.f32 %v2100_v50, %v422_v1  ;;  %v1519_v3 = vpop.f32.mrb[10].mxu0 }
 0x119   : > { %v2121_v4 = vadd.f32 %v1519_v3, %v2100_v50  ;;  %v2123_v5 = vpop.f32.mrb[11].mxu0 }
 0x11e   : > { %v1522_v6 = vpop.f32.mrb[12].mxu0 }
 0x11f   : > { %v2126_v7 = vadd.f32 %v1522_v6, %v2100_v50  ;;  %v438_v8 = vpop.f32.mrb[13].mxu0  ;;  %v2223_v6 = vadd.f32 %v2110_v58, %v2100_v50 }
 0x120   : > { %v2129_v9 = vadd.f32 %v2100_v50, %v438_v8  ;;  %v1523_v10 = vpop.f32.mrb[14].mxu0 }
 0x121   : > { %v2132_v11 = vadd.f32 %v1523_v10, %v2100_v50  ;;  %v441_v12 = vpop.f32.mrb[15].mxu0  ;;  %v523_v58 = vmul.f32 %v2223_v6, %v2223_v6 }
 0x122   : > { %v2135_v13 = vadd.f32 %v2100_v50, %v441_v12 }
 0x126   : > { %v1526_v14 = vpop.f32.mrb[16].mxu0 }
 0x127   : > { %v454_v15 = vpop.f32.mrb[17].mxu0  ;;  %v2154_v24 = vadd.f32 %v1526_v14, %v2100_v50  ;;  %v2234_v14 = vadd.f32 %v2100_v50, %v2123_v5  ;;  %v528_v5 = vmul.f32 %v2121_v4, %v2121_v4 }
 0x128   : > { %v2138_v16 = vadd.f32 %v2100_v50, %v454_v15  ;;  %v1527_v17 = vpop.f32.mrb[18].mxu0 }
 0x129   : > { %v2141_v18 = vadd.f32 %v1527_v17, %v2100_v50  ;;  %v457_v19 = vpop.f32.mrb[19].mxu0  ;;  %v535_v33 = vmul.f32 %v2154_v24, %v2154_v24  ;;  %v526_v15 = vmul.f32 %v2234_v14, %v2234_v14 }
 0x12a   : > { %v2144_v20 = vadd.f32 %v2100_v50, %v457_v19  ;;  %v533_v21 = vmul.f32 %v2138_v16, %v2138_v16 }
 0x12b   : > { %v536_v23 = vmul.f32 %v2141_v18, %v2141_v18 }
 0x12c   : > { %581 = vadd.xlane.f32.xlu0 %v533_v21  ;;  %v534_v26 = vmul.f32 %v2144_v20, %v2144_v20 }
 0x12d   : > { %587 = vadd.xlane.f32.xlu1 %v536_v23 }
 0x12e   : > { %v1530_v25 = vpop.f32.mrb[20].mxu0 }
 0x12f   : > { %v470_v27 = vpop.f32.mrb[21].mxu0  ;;  %v2203_v52 = vadd.f32 %v1530_v25, %v2100_v50  ;;  %v527_v25 = vmul.f32 %v2115_v0, %v2115_v0 }
 0x130   : > { %v1531_v29 = vpop.f32.mrb[22].mxu0  ;;  %583 = vadd.xlane.f32.xlu0 %v534_v26  ;;  %v2174_v36 = vadd.f32 %v2100_v50, %v470_v27  ;;  %v530_v26 = vmul.f32 %v2135_v13, %v2135_v13 }
 0x131   : > { %v473_v30 = vpop.f32.mrb[23].mxu0  ;;  %555 = vadd.xlane.f32.xlu1 %v520_v28  ;;  %v2182_v41 = vadd.f32 %v1531_v29, %v2100_v50  ;;  %v539_v8 = vmul.f32 %v2203_v52, %v2203_v52  ;;  %v529_v29 = vmul.f32 %v2129_v9, %v2129_v9 }
 0x132   : > { %v2164_v32 = vadd.f32 %v2100_v50, %v473_v30  ;;  %v537_v48 = vmul.f32 %v2174_v36, %v2174_v36  ;;  %v532_v30 = vmul.f32 %v2132_v11, %v2132_v11 }
 0x133   : > { %v540_v51 = vmul.f32 %v2182_v41, %v2182_v41 }
 0x134   : > { %585 = vadd.xlane.f32.xlu0 %v535_v33  ;;  %v538_v35 = vmul.f32 %v2164_v32, %v2164_v32 }
 0x136   : > { %591 = vadd.xlane.f32.xlu1 %v538_v35  ;;  %v1534_v38 = vpop.f32.mrb[24].mxu0  ;;  %v531_v35 = vmul.f32 %v2126_v7, %v2126_v7 }
 0x137   : > { %v2179_v39 = vadd.f32 %v1534_v38, %v2100_v50  ;;  %v486_v40 = vpop.f32.mrb[25].mxu0  ;;  %v758_v38 = vld [vmem:[#allocation2 + $0x8] sm:$0xff] }
 0x138   : > { %553 = vadd.xlane.f32.xlu0 %v519_v37  ;;  %v2187_v43 = vadd.f32 %v2100_v50, %v486_v40  ;;  %v1535_v44 = vpop.f32.mrb[26].mxu0  ;;  %v2271_v37 = vld [vmem:[%s2498_s3] sm:$0xff]   ;;  %v766_v40 = vld [vmem:[#allocation2 + $0x48] sm:$0xff] }
 0x139   : > { %v2190_v45 = vadd.f32 %v1535_v44, %v2100_v50  ;;  %v489_v46 = vpop.f32.mrb[27].mxu0  ;;  %v543_v21 = vmul.f32 %v2179_v39, %v2179_v39  ;;  %1502 = vmatprep.mubr.bf16.mxu1 %v2271_v37  ;;  %v757_v44 = vld [vmem:[#allocation2] sm:$0xff] }
 0x13a   : > { %559 = vadd.xlane.f32.xlu1 %v522_v42  ;;  %v2208_v55 = vadd.f32 %v2100_v50, %v489_v46  ;;  %v541_v17 = vmul.f32 %v2187_v43, %v2187_v43  ;;  %v1540_v42 = vpack.c.bf16 %v766_v40, %v758_v38  ;;  %v765_v46 = vld [vmem:[#allocation2 + $0x40] sm:$0xff] }
 0x13b   : > { %v544_v19 = vmul.f32 %v2190_v45, %v2190_v45 }
 0x13c   : > { %589 = vadd.xlane.f32.xlu0 %v537_v48  ;;  %v542_v10 = vmul.f32 %v2208_v55, %v2208_v55  ;;  %v1542_v48 = vpack.c.bf16 %v765_v46, %v757_v44  ;;  %1541 = vmatprep.subr.bf16.mxu0 %v1540_v42  ;;  %v837_v42 = vld [vmem:[#allocation2 + $0x280] sm:$0xff]  ;;  %v854_v46 = vld [vmem:[#allocation2 + $0x308] sm:$0xff] }
 0x13d   : > { %v845_v44 = vld [vmem:[#allocation2 + $0x2c0] sm:$0xff] }
 0x13e   : > { %595 = vadd.xlane.f32.xlu1 %v540_v51  ;;  %v1538_v57 = vpop.f32.mrb[28].mxu0  ;;  %v774_v51 = vld [vmem:[#allocation2 + $0x88] sm:$0xff]  ;;  %1543 = vmatpush1.bf16.msra.mxu0 %v1542_v48 }
 0x13f   : > { %v2211_v59 = vadd.f32 %v1538_v57, %v2100_v50  ;;  %v502_v60 = vpop.f32.mrb[29].mxu0  ;;  %v862_v48 = vld [vmem:[#allocation2 + $0x348] sm:$0xff] }
 0x140   : > { %557 = vadd.xlane.f32.xlu0 %v521_v54  ;;  %v2216_v62 = vadd.f32 %v2100_v50, %v502_v60  ;;  %v1539_v63 = vpop.f32.mrb[30].mxu0  ;;  %v782_v54 = vld [vmem:[#allocation2 + $0xc8] sm:$0xff]  ;;  %v773_v60 = vld [vmem:[#allocation2 + $0x80] sm:$0xff] }
 0x141   : > { %v2219_v1 = vadd.f32 %v1539_v63, %v2100_v50  ;;  %v505_v3 = vpop.f32.mrb[31].mxu0  ;;  %v547_v33 = vmul.f32 %v2211_v59, %v2211_v59  ;;  %v1544_v57 = vpack.c.bf16 %v782_v54, %v774_v51  ;;  %v1562_v51 = vpack.c.bf16 %v845_v44, %v837_v42 }
 0x142   : > { %563 = vadd.xlane.f32.xlu1 %v524_v61  ;;  %v2230_v12 = vadd.f32 %v2100_v50, %v505_v3  ;;  %v525_v50 = vmul.f32 %v2118_v2, %v2118_v2  ;;  %v545_v27 = vmul.f32 %v2216_v62, %v2216_v62  ;;  %v781_v61 = vld [vmem:[#allocation2 + $0xc0] sm:$0xff]  ;;  %v790_v3 = vld [vmem:[#allocation2 + $0x108] sm:$0xff]  ;;  %v1564_v54 = vpack.c.bf16 %v862_v48, %v854_v46 }
 0x143   : > { %v548_v28 = vmul.f32 %v2219_v1, %v2219_v1  ;;  %v1546_v63 = vpack.c.bf16 %v781_v61, %v773_v60  ;;  %1545 = vmatprep.subr.bf16.mxu0 %v1544_v57  ;;  %v853_v57 = vld [vmem:[#allocation2 + $0x300] sm:$0xff]  ;;  %v870_v61 = vld [vmem:[#allocation2 + $0x388] sm:$0xff] }
 0x144   : > { %593 = vadd.xlane.f32.xlu0 %v539_v8  ;;  %v546_v23 = vmul.f32 %v2230_v12, %v2230_v12  ;;  %v798_v8 = vld [vmem:[#allocation2 + $0x148] sm:$0xff]  ;;  %v861_v60 = vld [vmem:[#allocation2 + $0x340] sm:$0xff] }
 0x145   : > { %1547 = vmatpush1.bf16.msra.mxu0 %v1546_v63  ;;  %v878_v63 = vld [vmem:[#allocation2 + $0x3c8] sm:$0xff]  ;;  %v917_v48 = vld [vmem:[#allocation2 + $0x500] sm:$0xff] }
 0x146   : > { %599 = vadd.xlane.f32.xlu1 %v542_v10  ;;  %v1548_v10 = vpack.c.bf16 %v798_v8, %v790_v3  ;;  %v1566_v3 = vpack.c.bf16 %v861_v60, %v853_v57  ;;  %v1568_v8 = vpack.c.bf16 %v878_v63, %v870_v61  ;;  %v942_v57 = vld [vmem:[#allocation2 + $0x5c8] sm:$0xff] }
 0x148   : > { %561 = vadd.xlane.f32.xlu0 %v523_v58  ;;  %v789_v58 = vld [vmem:[#allocation2 + $0x100] sm:$0xff]  ;;  %1549 = vmatprep.subr.bf16.mxu0 %v1548_v10 }
 0x149   : > { %v869_v10 = vld [vmem:[#allocation2 + $0x380] sm:$0xff] }
 0x14a   : > { %567 = vadd.xlane.f32.xlu1 %v526_v15  ;;  %v797_v15 = vld [vmem:[#allocation2 + $0x140] sm:$0xff] }
 0x14c   : > { %597 = vadd.xlane.f32.xlu0 %v541_v17  ;;  %v1550_v17 = vpack.c.bf16 %v797_v15, %v789_v58  ;;  %v877_v58 = vld [vmem:[#allocation2 + $0x3c0] sm:$0xff]  ;;  %v886_v15 = vld [vmem:[#allocation2 + $0x408] sm:$0xff] }
 0x14e   : > { %603 = vadd.xlane.f32.xlu1 %v544_v19  ;;  %v806_v19 = vld [vmem:[#allocation2 + $0x188] sm:$0xff]  ;;  %1551 = vmatpush1.bf16.msra.mxu0 %v1550_v17 }
 0x14f   : > { %v894_v17 = vld [vmem:[#allocation2 + $0x448] sm:$0xff] }
 0x150   : > { %565 = vadd.xlane.f32.xlu0 %v525_v50  ;;  %v814_v50 = vld [vmem:[#allocation2 + $0x1c8] sm:$0xff] }
 0x152   : > { %571 = vadd.xlane.f32.xlu1 %v528_v5  ;;  %v1552_v5 = vpack.c.bf16 %v814_v50, %v806_v19  ;;  %v1570_v50 = vpack.c.bf16 %v877_v58, %v869_v10  ;;  %v941_v10 = vld [vmem:[#allocation2 + $0x5c0] sm:$0xff]  ;;  %v950_v58 = vld [vmem:[#allocation2 + $0x608] sm:$0xff] }
 0x154   : > { %601 = vadd.xlane.f32.xlu0 %v543_v21  ;;  %v805_v21 = vld [vmem:[#allocation2 + $0x180] sm:$0xff]  ;;  %1553 = vmatprep.subr.bf16.mxu0 %v1552_v5  ;;  %v1572_v5 = vpack.c.bf16 %v894_v17, %v886_v15  ;;  %v958_v15 = vld [vmem:[#allocation2 + $0x648] sm:$0xff] }
 0x156   : > { %607 = vadd.xlane.f32.xlu1 %v546_v23  ;;  %v813_v23 = vld [vmem:[#allocation2 + $0x1c0] sm:$0xff] }
 0x158   : > { %569 = vadd.xlane.f32.xlu0 %v527_v25  ;;  %v822_v25 = vld [vmem:[#allocation2 + $0x208] sm:$0xff] }
 0x15a   : > { %575 = vadd.xlane.f32.xlu1 %v530_v26  ;;  %v830_v26 = vld [vmem:[#allocation2 + $0x248] sm:$0xff] }
 0x15c   : > { %605 = vadd.xlane.f32.xlu0 %v545_v27  ;;  %v1554_v27 = vpack.c.bf16 %v813_v23, %v805_v21  ;;  %v885_v21 = vld [vmem:[#allocation2 + $0x400] sm:$0xff] }
 0x15d   : > { %v893_v23 = vld [vmem:[#allocation2 + $0x440] sm:$0xff] }
 0x15e   : > { %611 = vadd.xlane.f32.xlu1 %v548_v28  ;;  %v1556_v28 = vpack.c.bf16 %v830_v26, %v822_v25  ;;  %1555 = vmatpush1.bf16.msra.mxu0 %v1554_v27  ;;  %v902_v25 = vld [vmem:[#allocation2 + $0x488] sm:$0xff]  ;;  %v1574_v27 = vpack.c.bf16 %v893_v23, %v885_v21  ;;  %v949_v21 = vld [vmem:[#allocation2 + $0x600] sm:$0xff] }
 0x15f   : > { %v910_v26 = vld [vmem:[#allocation2 + $0x4c8] sm:$0xff] }
 0x160   : > { %573 = vadd.xlane.f32.xlu0 %v529_v29  ;;  %v821_v29 = vld [vmem:[#allocation2 + $0x200] sm:$0xff]  ;;  %1557 = vmatprep.subr.bf16.mxu0 %v1556_v28 }
 0x162   : > { %579 = vadd.xlane.f32.xlu1 %v532_v30  ;;  %v829_v30 = vld [vmem:[#allocation2 + $0x240] sm:$0xff] }
 0x163   : > { %v1558_v38 = vpack.c.bf16 %v829_v30, %v821_v29  ;;  %v1576_v29 = vpack.c.bf16 %v910_v26, %v902_v25  ;;  %v901_v30 = vld [vmem:[#allocation2 + $0x480] sm:$0xff]  ;;  %v966_v25 = vld [vmem:[#allocation2 + $0x688] sm:$0xff] }
 0x164   : > { %609 = vadd.xlane.f32.xlu0 %v547_v33  ;;  %v838_v33 = vld [vmem:[#allocation2 + $0x288] sm:$0xff] }
 0x165   : > { %1559 = vmatpush1.bf16.msra.mxu0 %v1558_v38  ;;  %v926_v38 = vld [vmem:[#allocation2 + $0x548] sm:$0xff] }
 0x166   : > { %v974_v26 = vld [vmem:[#allocation2 + $0x6c8] sm:$0xff] }
 0x168   : > { %577 = vadd.xlane.f32.xlu0 %v531_v35  ;;  %v846_v35 = vld [vmem:[#allocation2 + $0x2c8] sm:$0xff] }
 0x169   : > { %v1560_v40 = vpack.c.bf16 %v846_v35, %v838_v33  ;;  %v909_v33 = vld [vmem:[#allocation2 + $0x4c0] sm:$0xff]  ;;  %v918_v35 = vld [vmem:[#allocation2 + $0x508] sm:$0xff] }
 0x16a   : > { %v1578_v42 = vpack.c.bf16 %v909_v33, %v901_v30  ;;  %v1580_v46 = vpack.c.bf16 %v926_v38, %v918_v35  ;;  %v1592_v33 = vpack.c.bf16 %v974_v26, %v966_v25  ;;  %v965_v35 = vld [vmem:[#allocation2 + $0x680] sm:$0xff] }
 0x16b   : > { %1561 = vmatprep.subr.bf16.mxu0 %v1560_v40  ;;  %v973_v38 = vld [vmem:[#allocation2 + $0x6c0] sm:$0xff] }
 0x16c   : > { %1563 = vmatpush1.bf16.msra.mxu0 %v1562_v51  ;;  %v925_v51 = vld [vmem:[#allocation2 + $0x540] sm:$0xff] }
 0x16d   : > { %1565 = vmatprep.subr.bf16.mxu0 %v1564_v54  ;;  %v934_v54 = vld [vmem:[#allocation2 + $0x588] sm:$0xff]  ;;  %v1582_v61 = vpack.c.bf16 %v925_v51, %v917_v48  ;;  %v997_v26 = vld [vmem:[#allocation2 + $0x780] sm:$0xff] }
 0x170   : > { %1567 = vmatpush1.bf16.msra.mxu0 %v1566_v3  ;;  %v1584_v3 = vpack.c.bf16 %v942_v57, %v934_v54 }
 0x171   : > { %1569 = vmatprep.subr.bf16.mxu0 %v1568_v8  ;;  %v933_v8 = vld [vmem:[#allocation2 + $0x580] sm:$0xff] }
 0x174   : > { %1571 = vmatpush1.bf16.msra.mxu0 %v1570_v50  ;;  %v1586_v50 = vpack.c.bf16 %v941_v10, %v933_v8  ;;  %v981_v10 = vld [vmem:[#allocation2 + $0x700] sm:$0xff] }
 0x175   : > { %1573 = vmatprep.subr.bf16.mxu0 %v1572_v5  ;;  %v1588_v5 = vpack.c.bf16 %v958_v15, %v950_v58  ;;  %v989_v58 = vld [vmem:[#allocation2 + $0x740] sm:$0xff] }
 0x178   : > { %1575 = vmatpush1.bf16.msra.mxu0 %v1574_v27 }
 0x179   : > { %1577 = vmatprep.subr.bf16.mxu0 %v1576_v29 }
 0x17c   : > { %1579 = vmatpush1.bf16.msra.mxu0 %v1578_v42 }
 0x17d   : > { %1581 = vmatprep.subr.bf16.mxu0 %v1580_v46  ;;  %v990_v46 = vld [vmem:[#allocation2 + $0x748] sm:$0xff] }
 0x180   : > { %1583 = vmatpush1.bf16.msra.mxu0 %v1582_v61  ;;  %v1594_v61 = vpack.c.bf16 %v973_v38, %v965_v35 }
 0x181   : > { %1585 = vmatprep.subr.bf16.mxu0 %v1584_v3 }
 0x184   : > { %1587 = vmatpush1.bf16.msra.mxu0 %v1586_v50  ;;  %v998_v50 = vld [vmem:[#allocation2 + $0x788] sm:$0xff] }
 0x185   : > { %1589 = vmatprep.subr.bf16.mxu0 %v1588_v5  ;;  %v1006_v5 = vld [vmem:[#allocation2 + $0x7c8] sm:$0xff] }
 0x186   : > { %v1600_v25 = vpack.c.bf16 %v1006_v5, %v998_v50 }
 0x199   : > { %v550_v19 = vpop.xlane.xlu1 %549 }
 0x19d   : > { %v552_v28 = vpop.xlane.xlu1 %551 }
 0x19e   : > { %1854 = vrsqrt.f32 %v552_v28 }
 0x1a8   : > { %v1855_v27 = vpop.eup %1854 }
 0x1a9   : > { %v646_v51 = vmul.f32 %v1855_v27, %v2106_v56  ;;  %v1005_v27 = vld [vmem:[#allocation2 + $0x7c0] sm:$0xff] }
 0x1b9   : > { %v582_v40 = vpop.xlane.xlu0 %581 }
 0x1ba   : > { %v588_v44 = vpop.xlane.xlu1 %587  ;;  %1856 = vrsqrt.f32 %v582_v40 }
 0x1bb   : > { %1858 = vrsqrt.f32 %v550_v19  ;;  %v957_v19 = vld [vmem:[#allocation2 + $0x640] sm:$0xff] }
 0x1bc   : > { %v1590_v29 = vpack.c.bf16 %v957_v19, %v949_v21 }
 0x1bd   : > { %v584_v60 = vpop.xlane.xlu0 %583 }
 0x1be   : > { %1860 = vrsqrt.f32 %v584_v60  ;;  %v556_v63 = vpop.xlane.xlu1 %555  ;;  %1591 = vmatpush1.bf16.msra.mxu0 %v1590_v29 }
 0x1bf   : > { %1862 = vrsqrt.f32 %v588_v44  ;;  %v982_v44 = vld [vmem:[#allocation2 + $0x708] sm:$0xff]  ;;  %1593 = vmatprep.subr.bf16.mxu0 %v1592_v33 }
 0x1c0   : > { %v1596_v8 = vpack.c.bf16 %v990_v46, %v982_v44 }
 0x1c1   : > { %v586_v17 = vpop.xlane.xlu0 %585 }
 0x1c2   : > { %1864 = vrsqrt.f32 %v586_v17  ;;  %1595 = vmatpush1.bf16.msra.mxu0 %v1594_v61 }
 0x1c3   : > { %v592_v23 = vpop.xlane.xlu1 %591  ;;  %1866 = vrsqrt.f32 %v556_v63  ;;  %1597 = vmatprep.subr.bf16.mxu0 %v1596_v8 }
 0x1c4   : > { %v1857_v30 = vpop.eup %1856 }
 0x1c5   : > { %v554_v28 = vpop.xlane.xlu0 %553  ;;  %v1859_v40 = vpop.eup %1858  ;;  %v661_v57 = vmul.f32 %v1857_v30, %v2138_v16 }
 0x1c6   : > { %1868 = vrsqrt.f32 %v554_v28  ;;  %v645_v3 = vmul.f32 %v1859_v40, %v2103_v53 }
 0x1c7   : > { %v560_v42 = vpop.xlane.xlu1 %559  ;;  %1870 = vrsqrt.f32 %v592_v23  ;;  %v1598_v23 = vpack.c.bf16 %v989_v58, %v981_v10 }
 0x1c8   : > { %v1861_v48 = vpop.eup %1860  ;;  %v680_v21 = vpack.c.bf16 %v646_v51, %v645_v3 }
 0x1c9   : > { %v590_v54 = vpop.xlane.xlu0 %589  ;;  %v662_v60 = vmul.f32 %v1861_v48, %v2144_v20  ;;  %v1863_v63 = vpop.eup %1862  ;;  %1599 = vmatpush1.bf16.msra.mxu0 %v1598_v23 }
 0x1ca   : > { %1872 = vrsqrt.f32 %v590_v54  ;;  %v664_v19 = vmul.f32 %v1863_v63, %v2141_v18  ;;  %v1602_v18 = vpack.c.bf16 %v1005_v27, %v997_v26  ;;  %1601 = vmatprep.subr.bf16.mxu0 %v1600_v25 }
 0x1cb   : > { %v596_v15 = vpop.xlane.xlu1 %595  ;;  %v688_v17 = vpack.c.bf16 %v662_v60, %v661_v57  ;;  %1874 = vrsqrt.f32 %v560_v42 }
 0x1cc   : > { %v1865_v56 = vpop.eup %1864 }
 0x1cd   : > { %1486 = vmatprep.subr.bf16.mxu1 %v688_v17  ;;  %v558_v16 = vpop.xlane.xlu0 %557  ;;  %v663_v20 = vmul.f32 %v1865_v56, %v2154_v24  ;;  %v1867_v53 = vpop.eup %1866  ;;  %1603 = vmatpush1.bf16.msra.mxu0 %v1602_v18 }
 0x1ce   : > { %1876 = vrsqrt.f32 %v558_v16  ;;  %1487 = vmatpush3.bf16.xpose.msra.mxu1 %v680_v21  ;;  %v648_v24 = vmul.f32 %v1867_v53, %v2149_v22 }
 0x1cf   : > { %v564_v28 = vpop.xlane.xlu1 %563  ;;  %v689_v29 = vpack.c.bf16 %v664_v19, %v663_v20  ;;  %1878 = vrsqrt.f32 %v596_v15 }
 0x1d0   : > { %v1869_v30 = vpop.eup %1868 }
 0x1d1   : > { %v594_v33 = vpop.xlane.xlu0 %593  ;;  %1488 = vmatprep.subr.bf16.mxu1 %v689_v29  ;;  %v647_v35 = vmul.f32 %v1869_v30, %v2161_v31  ;;  %v1871_v38 = vpop.eup %1870 }
 0x1d2   : > { %1880 = vrsqrt.f32 %v594_v33  ;;  %v666_v51 = vmul.f32 %v1871_v38, %v2164_v32 }
 0x1d3   : > { %v600_v40 = vpop.xlane.xlu1 %599  ;;  %v681_v42 = vpack.c.bf16 %v648_v24, %v647_v35  ;;  %1882 = vrsqrt.f32 %v564_v28 }
 0x1d4   : > { %v1873_v44 = vpop.eup %1872 }
 0x1d5   : > { %v562_v46 = vpop.xlane.xlu0 %561  ;;  %v665_v48 = vmul.f32 %v1873_v44, %v2174_v36  ;;  %v1875_v54 = vpop.eup %1874 }
 0x1d6   : > { %1884 = vrsqrt.f32 %v562_v46  ;;  %1489 = vmatpush3.bf16.xpose.msra.mxu1 %v681_v42  ;;  %v650_v63 = vmul.f32 %v1875_v54, %v2169_v34 }
 0x1d7   : > { %v568_v31 = vpop.xlane.xlu1 %567  ;;  %v690_v22 = vpack.c.bf16 %v666_v51, %v665_v48  ;;  %1886 = vrsqrt.f32 %v600_v40 }
 0x1d8   : > { %v1877_v57 = vpop.eup %1876 }
 0x1d9   : > { %v598_v60 = vpop.xlane.xlu0 %597  ;;  %1490 = vmatprep.subr.bf16.mxu1 %v690_v22  ;;  %v649_v61 = vmul.f32 %v1877_v57, %v2193_v47  ;;  %v1879_v3 = vpop.eup %1878 }
 0x1da   : > { %1888 = vrsqrt.f32 %v598_v60  ;;  %v668_v15 = vmul.f32 %v1879_v3, %v2182_v41 }
 0x1db   : > { %v604_v8 = vpop.xlane.xlu1 %603  ;;  %v682_v36 = vpack.c.bf16 %v650_v63, %v649_v61  ;;  %1890 = vrsqrt.f32 %v568_v31 }
 0x1dc   : > { %v1881_v10 = vpop.eup %1880 }
 0x1dd   : > { %v566_v32 = vpop.xlane.xlu0 %565  ;;  %v667_v58 = vmul.f32 %v1881_v10, %v2203_v52  ;;  %v1883_v17 = vpop.eup %1882 }
 0x1de   : > { %1892 = vrsqrt.f32 %v566_v32  ;;  %1491 = vmatpush3.bf16.xpose.msra.mxu1 %v682_v36  ;;  %v652_v21 = vmul.f32 %v1883_v17, %v2198_v49  ;;  %v760_v32 = vld [vmem:[#allocation2 + $0x18] sm:$0xff] }
 0x1df   : > { %v572_v50 = vpop.xlane.xlu1 %571  ;;  %v691_v5 = vpack.c.bf16 %v668_v15, %v667_v58  ;;  %1894 = vrsqrt.f32 %v604_v8  ;;  %v768_v58 = vld [vmem:[#allocation2 + $0x58] sm:$0xff] }
 0x1e0   : > { %v1885_v56 = vpop.eup %1884 }
 0x1e1   : > { %v602_v47 = vpop.xlane.xlu0 %601  ;;  %1492 = vmatprep.subr.bf16.mxu1 %v691_v5  ;;  %v651_v34 = vmul.f32 %v1885_v56, %v2223_v6  ;;  %v1887_v16 = vpop.eup %1886  ;;  %v767_v5 = vld [vmem:[#allocation2 + $0x50] sm:$0xff]  ;;  %v784_v56 = vld [vmem:[#allocation2 + $0xd8] sm:$0xff] }
 0x1e2   : > { %1896 = vrsqrt.f32 %v602_v47  ;;  %v670_v53 = vmul.f32 %v1887_v16, %v2208_v55  ;;  %v783_v16 = vld [vmem:[#allocation2 + $0xd0] sm:$0xff] }
 0x1e3   : > { %v608_v20 = vpop.xlane.xlu1 %607  ;;  %v683_v19 = vpack.c.bf16 %v652_v21, %v651_v34  ;;  %1898 = vrsqrt.f32 %v572_v50  ;;  %v759_v50 = vld [vmem:[#allocation2 + $0x10] sm:$0xff] }
 0x1e4   : > { %v1889_v52 = vpop.eup %1888  ;;  %v1606_v47 = vpack.c.bf16 %v767_v5, %v759_v50  ;;  %v775_v21 = vld [vmem:[#allocation2 + $0x90] sm:$0xff]  ;;  %v944_v50 = vld [vmem:[#allocation2 + $0x5d8] sm:$0xff] }
 0x1e5   : > { %v570_v41 = vpop.xlane.xlu0 %569  ;;  %v669_v23 = vmul.f32 %v1889_v52, %v2187_v43  ;;  %v1891_v25 = vpop.eup %1890  ;;  %v791_v52 = vld [vmem:[#allocation2 + $0x110] sm:$0xff] }
 0x1e6   : > { %1900 = vrsqrt.f32 %v570_v41  ;;  %1493 = vmatpush3.bf16.xpose.msra.mxu1 %v683_v19  ;;  %v654_v29 = vmul.f32 %v1891_v25, %v2234_v14  ;;  %v799_v41 = vld [vmem:[#allocation2 + $0x150] sm:$0xff] }
 0x1e7   : > { %v576_v26 = vpop.xlane.xlu1 %575  ;;  %v692_v27 = vpack.c.bf16 %v670_v53, %v669_v23  ;;  %1902 = vrsqrt.f32 %v608_v20  ;;  %v792_v20 = vld [vmem:[#allocation2 + $0x118] sm:$0xff]  ;;  %v1614_v25 = vpack.c.bf16 %v799_v41, %v791_v52 }
 0x1e8   : > { %v1893_v28 = vpop.eup %1892  ;;  %v808_v23 = vld [vmem:[#allocation2 + $0x198] sm:$0xff] }
 0x1e9   : > { %v606_v6 = vpop.xlane.xlu0 %605  ;;  %1494 = vmatprep.subr.bf16.mxu1 %v692_v27  ;;  %v653_v49 = vmul.f32 %v1893_v28, %v2118_v2  ;;  %v1895_v30 = vpop.eup %1894  ;;  %v816_v53 = vld [vmem:[#allocation2 + $0x1d8] sm:$0xff]  ;;  %v807_v27 = vld [vmem:[#allocation2 + $0x190] sm:$0xff] }
 0x1ea   : > { %1904 = vrsqrt.f32 %v606_v6  ;;  %v672_v18 = vmul.f32 %v1895_v30, %v2190_v45  ;;  %v815_v28 = vld [vmem:[#allocation2 + $0x1d0] sm:$0xff]  ;;  %v824_v6 = vld [vmem:[#allocation2 + $0x218] sm:$0xff] }
 0x1eb   : > { %v612_v33 = vpop.xlane.xlu1 %611  ;;  %v684_v35 = vpack.c.bf16 %v654_v29, %v653_v49  ;;  %1906 = vrsqrt.f32 %v576_v26  ;;  %v1616_v26 = vpack.c.bf16 %v816_v53, %v808_v23  ;;  %v832_v49 = vld [vmem:[#allocation2 + $0x258] sm:$0xff]  ;;  %v823_v30 = vld [vmem:[#allocation2 + $0x210] sm:$0xff] }
 0x1ec   : > { %v1897_v43 = vpop.eup %1896  ;;  %v1620_v29 = vpack.c.bf16 %v832_v49, %v824_v6  ;;  %v967_v23 = vld [vmem:[#allocation2 + $0x690] sm:$0xff] }
 0x1ed   : > { %v574_v55 = vpop.xlane.xlu0 %573  ;;  %v671_v24 = vmul.f32 %v1897_v43, %v2179_v39  ;;  %v1899_v38 = vpop.eup %1898  ;;  %v848_v43 = vld [vmem:[#allocation2 + $0x2d8] sm:$0xff]  ;;  %v975_v53 = vld [vmem:[#allocation2 + $0x6d0] sm:$0xff] }
 0x1ee   : > { %1908 = vrsqrt.f32 %v574_v55  ;;  %1495 = vmatpush3.bf16.xpose.msra.mxu1 %v684_v35  ;;  %v656_v46 = vmul.f32 %v1899_v38, %v2121_v4  ;;  %v840_v35 = vld [vmem:[#allocation2 + $0x298] sm:$0xff]  ;;  %v847_v38 = vld [vmem:[#allocation2 + $0x2d0] sm:$0xff] }
 0x1ef   : > { %v693_v40 = vpack.c.bf16 %v672_v18, %v671_v24  ;;  %1910 = vrsqrt.f32 %v612_v33  ;;  %v580_v2 = vpop.xlane.xlu1 %579  ;;  %v831_v33 = vld [vmem:[#allocation2 + $0x250] sm:$0xff]  ;;  %v1624_v24 = vpack.c.bf16 %v848_v43, %v840_v35 }
 0x1f0   : > { %v1901_v42 = vpop.eup %1900  ;;  %v1622_v55 = vpack.c.bf16 %v831_v33, %v823_v30  ;;  %v839_v18 = vld [vmem:[#allocation2 + $0x290] sm:$0xff] }
 0x1f1   : > { %v610_v44 = vpop.xlane.xlu0 %609  ;;  %1496 = vmatprep.subr.bf16.mxu1 %v693_v40  ;;  %v655_v14 = vmul.f32 %v1901_v42, %v2115_v0  ;;  %v1903_v48 = vpop.eup %1902  ;;  %v856_v40 = vld [vmem:[#allocation2 + $0x318] sm:$0xff]  ;;  %v983_v6 = vld [vmem:[#allocation2 + $0x710] sm:$0xff] }
 0x1f2   : > { %1912 = vrsqrt.f32 %v610_v44  ;;  %v674_v31 = vmul.f32 %v1903_v48, %v2230_v12  ;;  %v864_v42 = vld [vmem:[#allocation2 + $0x358] sm:$0xff]  ;;  %v991_v49 = vld [vmem:[#allocation2 + $0x750] sm:$0xff] }
 0x1f3   : > { %v685_v51 = vpack.c.bf16 %v656_v46, %v655_v14  ;;  %1914 = vrsqrt.f32 %v580_v2  ;;  %v1626_v2 = vpack.c.bf16 %v847_v38, %v839_v18  ;;  %v1628_v44 = vpack.c.bf16 %v864_v42, %v856_v40  ;;  %v855_v14 = vld [vmem:[#allocation2 + $0x310] sm:$0xff]  ;;  %v872_v48 = vld [vmem:[#allocation2 + $0x398] sm:$0xff]  ;;  %v770_v18 = vld [vmem:[#allocation2 + $0x68] sm:$0xff] }
 0x1f4   : > { %v1905_v54 = vpop.eup %1904  ;;  %v863_v46 = vld [vmem:[#allocation2 + $0x350] sm:$0xff]  ;;  %v1662_v30 = vpack.c.bf16 %v991_v49, %v983_v6  ;;  %v764_v38 = vld [vmem:[#allocation2 + $0x38] sm:$0xff] }
 0x1f5   : > { %v578_v39 = vpop.xlane.xlu0 %577  ;;  %v673_v45 = vmul.f32 %v1905_v54, %v2216_v62  ;;  %v1907_v22 = vpop.eup %1906  ;;  %v1630_v54 = vpack.c.bf16 %v863_v46, %v855_v14  ;;  %v999_v35 = vld [vmem:[#allocation2 + $0x790] sm:$0xff]  ;;  %v772_v42 = vld [vmem:[#allocation2 + $0x78] sm:$0xff]  ;;  %v769_v14 = vld [vmem:[#allocation2 + $0x60] sm:$0xff] }
 0x1f6   : > { %1916 = vrsqrt.f32 %v578_v39  ;;  %1497 = vmatpush3.bf16.xpose.msra.mxu1 %v685_v51  ;;  %v658_v4 = vmul.f32 %v1907_v22, %v2135_v13  ;;  %v1604_v13 = vpack.c.bf16 %v768_v58, %v760_v32  ;;  %v880_v51 = vld [vmem:[#allocation2 + $0x3d8] sm:$0xff]  ;;  %v1007_v43 = vld [vmem:[#allocation2 + $0x7d0] sm:$0xff] }
 0x1f7   : > { %v694_v57 = vpack.c.bf16 %v674_v31, %v673_v45  ;;  %v1632_v39 = vpack.c.bf16 %v880_v51, %v872_v48  ;;  %v871_v45 = vld [vmem:[#allocation2 + $0x390] sm:$0xff]  ;;  %v888_v22 = vld [vmem:[#allocation2 + $0x418] sm:$0xff]  ;;  %v778_v51 = vld [vmem:[#allocation2 + $0xa8] sm:$0xff] }
 0x1f8   : > { %v1909_v60 = vpop.eup %1908  ;;  %v879_v31 = vld [vmem:[#allocation2 + $0x3d0] sm:$0xff]  ;;  %v928_v32 = vld [vmem:[#allocation2 + $0x558] sm:$0xff] }
 0x1f9   : > { %1498 = vmatprep.subr.bf16.mxu1 %v694_v57  ;;  %v657_v0 = vmul.f32 %v1909_v60, %v2129_v9  ;;  %v1911_v61 = vpop.eup %1910  ;;  %v896_v57 = vld [vmem:[#allocation2 + $0x458] sm:$0xff]  ;;  %v1634_v60 = vpack.c.bf16 %v879_v31, %v871_v45  ;;  %v763_v46 = vld [vmem:[#allocation2 + $0x30] sm:$0xff] }
 0x1fa   : > { %v676_v36 = vmul.f32 %v1911_v61, %v2219_v1  ;;  %v1853_v1 = vld [vmem:[%s2498_s3 + $0x8] ss:$0 sps:$4 sm:$0x33]   ;;  %v895_v61 = vld [vmem:[#allocation2 + $0x450] sm:$0xff]  ;;  %v788_v45 = vld [vmem:[#allocation2 + $0xf8] sm:$0xff] }
 0x1fb   : > { %v686_v63 = vpack.c.bf16 %v658_v4, %v657_v0  ;;  %v1636_v0 = vpack.c.bf16 %v896_v57, %v888_v22  ;;  %v887_v4 = vld [vmem:[#allocation2 + $0x410] sm:$0xff]  ;;  %v836_v6 = vld [vmem:[#allocation2 + $0x278] sm:$0xff] }
 0x1fc   : > { %v1913_v3 = vpop.eup %1912  ;;  %v771_v48 = vld [vmem:[#allocation2 + $0x70] sm:$0xff] }
 0x1fd   : > { %v675_v8 = vmul.f32 %v1913_v3, %v2211_v59  ;;  %v1915_v62 = vpop.eup %1914  ;;  %v776_v59 = vld [vmem:[#allocation2 + $0x98] sm:$0xff]  ;;  %v2315_v57 = vpack.c.bf16 %v771_v48, %v763_v46  ;;  %v841_v48 = vld [vmem:[#allocation2 + $0x2a0] sm:$0xff] }
 0x1fe   : > { %1499 = vmatpush3.bf16.xpose.msra.mxu1 %v686_v63  ;;  %v660_v9 = vmul.f32 %v1915_v62, %v2132_v11  ;;  %v1608_v34 = vpack.c.bf16 %v784_v56, %v776_v59  ;;  %v1610_v11 = vpack.c.bf16 %v783_v16, %v775_v21  ;;  %v904_v63 = vld [vmem:[#allocation2 + $0x498] sm:$0xff]  ;;  %v903_v62 = vld [vmem:[#allocation2 + $0x490] sm:$0xff] }
 0x1ff   : > { %v695_v12 = vpack.c.bf16 %v676_v36, %v675_v8  ;;  %v912_v3 = vld [vmem:[#allocation2 + $0x4d8] sm:$0xff]  ;;  %v1638_v8 = vpack.c.bf16 %v895_v61, %v887_v4  ;;  %v935_v56 = vld [vmem:[#allocation2 + $0x590] sm:$0xff] }
 0x200   : > { %v1917_v10 = vpop.eup %1916  ;;  %v1640_v36 = vpack.c.bf16 %v912_v3, %v904_v63  ;;  %v779_v61 = vld [vmem:[#allocation2 + $0xb0] sm:$0xff]  ;;  %v794_v3 = vld [vmem:[#allocation2 + $0x128] sm:$0xff] }
 0x201   : > { %1500 = vmatprep.subr.bf16.mxu1 %v695_v12  ;;  %v659_v15 = vmul.f32 %v1917_v10, %v2126_v7  ;;  %v800_v7 = vld [vmem:[#allocation2 + $0x158] sm:$0xff]  ;;  %v911_v12 = vld [vmem:[#allocation2 + $0x4d0] sm:$0xff] }
 0x202   : > { %v1612_v19 = vpack.c.bf16 %v800_v7, %v792_v20  ;;  %v920_v10 = vld [vmem:[#allocation2 + $0x518] sm:$0xff]  ;;  %v1642_v58 = vpack.c.bf16 %v911_v12, %v903_v62  ;;  %v951_v20 = vld [vmem:[#allocation2 + $0x610] sm:$0xff]  ;;  %v802_v12 = vld [vmem:[#allocation2 + $0x168] sm:$0xff] }
 0x203   : > { %v687_v17 = vpack.c.bf16 %v660_v9, %v659_v15  ;;  %v1644_v15 = vpack.c.bf16 %v928_v32, %v920_v10  ;;  %v919_v9 = vld [vmem:[#allocation2 + $0x510] sm:$0xff]  ;;  %v796_v10 = vld [vmem:[#allocation2 + $0x138] sm:$0xff] }
 0x204   : > { %v959_v7 = vld [vmem:[#allocation2 + $0x650] sm:$0xff]  ;;  %v804_v32 = vld [vmem:[#allocation2 + $0x178] sm:$0xff] }
 0x205   : > { %v1654_v52 = vpack.c.bf16 %v959_v7, %v951_v20  ;;  %v787_v63 = vld [vmem:[#allocation2 + $0xf0] sm:$0xff] }
 0x206   : > { %1501 = vmatpush3.bf16.xpose.msra.mxu1 %v687_v17  ;;  %v927_v17 = vld [vmem:[#allocation2 + $0x550] sm:$0xff] }
 0x207   : > { %1605 = vmatprep.subr.bf16.mxu1 %v1604_v13  ;;  %v936_v13 = vld [vmem:[#allocation2 + $0x598] sm:$0xff]  ;;  %v1646_v5 = vpack.c.bf16 %v927_v17, %v919_v9  ;;  %v2330_v9 = vpack.c.bf16 %v787_v63, %v779_v61  ;;  %v793_v17 = vld [vmem:[#allocation2 + $0x120] sm:$0xff] }
 0x208   : > { %v1648_v59 = vpack.c.bf16 %v944_v50, %v936_v13  ;;  %v1676_v13 = vpack.c.bf16 %v802_v12, %v794_v3  ;;  %v2334_v50 = vpack.c.bf16 %v804_v32, %v796_v10  ;;  %v860_v61 = vld [vmem:[#allocation2 + $0x338] sm:$0xff]  ;;  %v857_v12 = vld [vmem:[#allocation2 + $0x320] sm:$0xff] }
 0x209   : > { %v868_v63 = vld [vmem:[#allocation2 + $0x378] sm:$0xff]  ;;  %v865_v10 = vld [vmem:[#allocation2 + $0x360] sm:$0xff] }
 0x20d   : > { %1503 = vmatmul.mubr.bf16.vlgmr.msra.gmra.mrb[0].mxu1 %v2271_v37  ;;  %v1618_v37 = vpack.c.bf16 %v815_v28, %v807_v27  ;;  %v1658_v27 = vpack.c.bf16 %v975_v53, %v967_v23  ;;  %v819_v23 = vld [vmem:[#allocation2 + $0x1f0] sm:$0xff]  ;;  %v826_v53 = vld [vmem:[#allocation2 + $0x228] sm:$0xff] }
 0x20e   : > { %1504 = vmatprep.mubr.bf16.mxu1 %v1853_v1  ;;  %1607 = vmatpush1.bf16.msra.mxu1 %v1606_v47  ;;  %v952_v47 = vld [vmem:[#allocation2 + $0x618] sm:$0xff] }
 0x20f   : > { %1609 = vmatprep.subr.bf16.mxu1 %v1608_v34  ;;  %v960_v34 = vld [vmem:[#allocation2 + $0x658] sm:$0xff] }
 0x210   : > { %v1652_v16 = vpack.c.bf16 %v960_v34, %v952_v47  ;;  %v818_v47 = vld [vmem:[#allocation2 + $0x1e8] sm:$0xff]  ;;  %v812_v34 = vld [vmem:[#allocation2 + $0x1b8] sm:$0xff] }
 0x212   : > { %1611 = vmatpush1.bf16.msra.mxu1 %v1610_v11  ;;  %v968_v11 = vld [vmem:[#allocation2 + $0x698] sm:$0xff] }
 0x213   : > { %1613 = vmatprep.subr.bf16.mxu1 %v1612_v19  ;;  %v976_v19 = vld [vmem:[#allocation2 + $0x6d8] sm:$0xff] }
 0x214   : > { %v1656_v41 = vpack.c.bf16 %v976_v19, %v968_v11  ;;  %v809_v11 = vld [vmem:[#allocation2 + $0x1a0] sm:$0xff] }
 0x215   : > { %1505 = vmatmul.mubr.bf16.gmra.mrb[4].mxu1 %v1853_v1  ;;  %v943_v1 = vld [vmem:[#allocation2 + $0x5d0] sm:$0xff]  ;;  %v817_v19 = vld [vmem:[#allocation2 + $0x1e0] sm:$0xff] }
 0x216   : > { %1615 = vmatpush1.bf16.msra.mxu1 %v1614_v25  ;;  %v1650_v21 = vpack.c.bf16 %v943_v1, %v935_v56  ;;  %v984_v25 = vld [vmem:[#allocation2 + $0x718] sm:$0xff]  ;;  %v803_v56 = vld [vmem:[#allocation2 + $0x170] sm:$0xff]  ;;  %v810_v1 = vld [vmem:[#allocation2 + $0x1a8] sm:$0xff] }
 0x217   : > { %1617 = vmatprep.subr.bf16.mxu1 %v1616_v26  ;;  %v992_v26 = vld [vmem:[#allocation2 + $0x758] sm:$0xff] }
 0x218   : > { %v1660_v28 = vpack.c.bf16 %v992_v26, %v984_v25  ;;  %v1680_v25 = vpack.c.bf16 %v818_v47, %v810_v1  ;;  %v884_v1 = vld [vmem:[#allocation2 + $0x3f8] sm:$0xff]  ;;  %v1694_v47 = vpack.c.bf16 %v865_v10, %v857_v12 }
 0x21a   : > { %1619 = vmatpush1.bf16.msra.mxu1 %v1618_v37  ;;  %v1000_v37 = vld [vmem:[#allocation2 + $0x798] sm:$0xff] }
 0x21b   : > { %1621 = vmatprep.subr.bf16.mxu1 %v1620_v29  ;;  %v1008_v29 = vld [vmem:[#allocation2 + $0x7d8] sm:$0xff] }
 0x21c   : > { %v1664_v33 = vpack.c.bf16 %v1008_v29, %v1000_v37  ;;  %v1682_v29 = vpack.c.bf16 %v817_v19, %v809_v11 }
 0x21e   : > { %1623 = vmatpush1.bf16.msra.mxu1 %v1622_v55  ;;  %v1666_v55 = vpack.c.bf16 %v1007_v43, %v999_v35  ;;  %v833_v35 = vld [vmem:[#allocation2 + $0x260] sm:$0xff] }
 0x21f   : > { %1625 = vmatprep.subr.bf16.mxu1 %v1624_v24  ;;  %v762_v24 = vld [vmem:[#allocation2 + $0x28] sm:$0xff] }
 0x220   : > { %v1668_v40 = vpack.c.bf16 %v770_v18, %v762_v24  ;;  %v827_v24 = vld [vmem:[#allocation2 + $0x230] sm:$0xff] }
 0x221   : > { %v835_v18 = vld [vmem:[#allocation2 + $0x270] sm:$0xff] }
 0x222   : > { %1627 = vmatpush1.bf16.msra.mxu1 %v1626_v2  ;;  %v2310_v2 = vpack.c.bf16 %v772_v42, %v764_v38  ;;  %1669 = vmatprep.subr.bf16.mxu0 %v1668_v40  ;;  %v842_v38 = vld [vmem:[#allocation2 + $0x2a8] sm:$0xff]  ;;  %v844_v42 = vld [vmem:[#allocation2 + $0x2b8] sm:$0xff]  ;;  %v2362_v46 = vpack.c.bf16 %v835_v18, %v827_v24  ;;  %v899_v24 = vld [vmem:[#allocation2 + $0x470] sm:$0xff] }
 0x223   : > { %1629 = vmatprep.subr.bf16.mxu1 %v1628_v44  ;;  %v761_v44 = vld [vmem:[#allocation2 + $0x20] sm:$0xff]  ;;  %v850_v40 = vld [vmem:[#allocation2 + $0x2e8] sm:$0xff] }
 0x224   : > { %v1670_v22 = vpack.c.bf16 %v769_v14, %v761_v44  ;;  %v852_v44 = vld [vmem:[#allocation2 + $0x2f8] sm:$0xff]  ;;  %v906_v18 = vld [vmem:[#allocation2 + $0x4a8] sm:$0xff] }
 0x226   : > { %1631 = vmatpush1.bf16.msra.mxu1 %v1630_v54  ;;  %v786_v54 = vld [vmem:[#allocation2 + $0xe8] sm:$0xff] }
 0x227   : > { %1633 = vmatprep.subr.bf16.mxu1 %v1632_v39  ;;  %v780_v39 = vld [vmem:[#allocation2 + $0xb8] sm:$0xff] }
 0x228   : > { %v2323_v62 = vpack.c.bf16 %v788_v45, %v780_v39  ;;  %v2365_v39 = vpack.c.bf16 %v852_v44, %v844_v42  ;;  %v843_v45 = vld [vmem:[#allocation2 + $0x2b0] sm:$0xff]  ;;  %v916_v42 = vld [vmem:[#allocation2 + $0x4f8] sm:$0xff] }
 0x22a   : > { %1635 = vmatpush1.bf16.msra.mxu1 %v1634_v60  ;;  %v777_v60 = vld [vmem:[#allocation2 + $0xa0] sm:$0xff] }
 0x22b   : > { %1637 = vmatprep.subr.bf16.mxu1 %v1636_v0  ;;  %v785_v0 = vld [vmem:[#allocation2 + $0xe0] sm:$0xff] }
 0x22e   : > { %1639 = vmatpush1.bf16.msra.mxu1 %v1638_v8 }
 0x22f   : > { %1641 = vmatprep.subr.bf16.mxu1 %v1640_v36  ;;  %v1672_v36 = vpack.c.bf16 %v786_v54, %v778_v51  ;;  %v849_v51 = vld [vmem:[#allocation2 + $0x2e0] sm:$0xff]  ;;  %v1688_v54 = vpack.c.bf16 %v850_v40, %v842_v38  ;;  %v914_v38 = vld [vmem:[#allocation2 + $0x4e8] sm:$0xff]  ;;  %v908_v40 = vld [vmem:[#allocation2 + $0x4b8] sm:$0xff] }
 0x230   : > { %v1690_v3 = vpack.c.bf16 %v849_v51, %v841_v48  ;;  %v905_v48 = vld [vmem:[#allocation2 + $0x4a0] sm:$0xff] }
 0x231   : > { %v913_v51 = vld [vmem:[#allocation2 + $0x4e0] sm:$0xff] }
 0x232   : > { %1643 = vmatpush1.bf16.msra.mxu1 %v1642_v58  ;;  %v1706_v12 = vpack.c.bf16 %v913_v51, %v905_v48  ;;  %v955_v48 = vld [vmem:[#allocation2 + $0x630] sm:$0xff] }
 0x233   : > { %1645 = vmatprep.subr.bf16.mxu1 %v1644_v15  ;;  %v1674_v15 = vpack.c.bf16 %v785_v0, %v777_v60  ;;  %v858_v60 = vld [vmem:[#allocation2 + $0x328] sm:$0xff]  ;;  %v963_v51 = vld [vmem:[#allocation2 + $0x670] sm:$0xff] }
 0x234   : > { %v866_v0 = vld [vmem:[#allocation2 + $0x368] sm:$0xff] }
 0x235   : > { %v1692_v32 = vpack.c.bf16 %v866_v0, %v858_v60  ;;  %v915_v60 = vld [vmem:[#allocation2 + $0x4f0] sm:$0xff]  ;;  %v922_v0 = vld [vmem:[#allocation2 + $0x528] sm:$0xff] }
 0x236   : > { %1647 = vmatpush1.bf16.msra.mxu1 %v1646_v5  ;;  %v801_v5 = vld [vmem:[#allocation2 + $0x160] sm:$0xff] }
 0x237   : > { %1649 = vmatprep.subr.bf16.mxu1 %v1648_v59  ;;  %v795_v59 = vld [vmem:[#allocation2 + $0x130] sm:$0xff]  ;;  %v1678_v20 = vpack.c.bf16 %v801_v5, %v793_v17  ;;  %v874_v5 = vld [vmem:[#allocation2 + $0x3a8] sm:$0xff] }
 0x238   : > { %v2342_v7 = vpack.c.bf16 %v803_v56, %v795_v59  ;;  %v859_v17 = vld [vmem:[#allocation2 + $0x330] sm:$0xff]  ;;  %v882_v59 = vld [vmem:[#allocation2 + $0x3e8] sm:$0xff]  ;;  %v876_v56 = vld [vmem:[#allocation2 + $0x3b8] sm:$0xff] }
 0x239   : > { %v1696_v11 = vpack.c.bf16 %v882_v59, %v874_v5  ;;  %v2377_v19 = vpack.c.bf16 %v884_v1, %v876_v56  ;;  %v923_v59 = vld [vmem:[#allocation2 + $0x530] sm:$0xff]  ;;  %v938_v1 = vld [vmem:[#allocation2 + $0x5a8] sm:$0xff] }
 0x23a   : > { %1651 = vmatpush1.bf16.msra.mxu1 %v1650_v21  ;;  %v820_v21 = vld [vmem:[#allocation2 + $0x1f8] sm:$0xff]  ;;  %v931_v56 = vld [vmem:[#allocation2 + $0x570] sm:$0xff] }
 0x23b   : > { %1653 = vmatprep.subr.bf16.mxu1 %v1652_v16  ;;  %v2349_v26 = vpack.c.bf16 %v820_v21, %v812_v34  ;;  %v873_v21 = vld [vmem:[#allocation2 + $0x3a0] sm:$0xff] }
 0x23e   : > { %1655 = vmatpush1.bf16.msra.mxu1 %v1654_v52 }
 0x23f   : > { %1657 = vmatprep.subr.bf16.mxu1 %v1656_v41  ;;  %v811_v41 = vld [vmem:[#allocation2 + $0x1b0] sm:$0xff] }
 0x242   : > { %1659 = vmatpush1.bf16.msra.mxu1 %v1658_v27  ;;  %v834_v27 = vld [vmem:[#allocation2 + $0x268] sm:$0xff] }
 0x243   : > { %1661 = vmatprep.subr.bf16.mxu1 %v1660_v28  ;;  %v828_v28 = vld [vmem:[#allocation2 + $0x238] sm:$0xff]  ;;  %v1684_v43 = vpack.c.bf16 %v834_v27, %v826_v53  ;;  %v890_v53 = vld [vmem:[#allocation2 + $0x428] sm:$0xff] }
 0x244   : > { %v892_v27 = vld [vmem:[#allocation2 + $0x438] sm:$0xff] }
 0x246   : > { %1663 = vmatpush1.bf16.msra.mxu1 %v1662_v30  ;;  %v2354_v30 = vpack.c.bf16 %v819_v23, %v811_v41  ;;  %v875_v41 = vld [vmem:[#allocation2 + $0x3b0] sm:$0xff] }
 0x247   : > { %1665 = vmatprep.subr.bf16.mxu1 %v1664_v33  ;;  %v825_v33 = vld [vmem:[#allocation2 + $0x220] sm:$0xff]  ;;  %v883_v23 = vld [vmem:[#allocation2 + $0x3f0] sm:$0xff] }
 0x248   : > { %v1686_v14 = vpack.c.bf16 %v833_v35, %v825_v33 }
 0x24a   : > { %1667 = vmatpush1.bf16.msra.mxu1 %v1666_v55  ;;  %v2358_v55 = vpack.c.bf16 %v836_v6, %v828_v28  ;;  %v900_v28 = vld [vmem:[#allocation2 + $0x478] sm:$0xff] }
 0x24b   : > { %1796 = vmatprep.subr.bf16.mxu1 %v2310_v2  ;;  %v2383_v35 = vpack.c.bf16 %v900_v28, %v892_v27  ;;  %v939_v28 = vld [vmem:[#allocation2 + $0x5b0] sm:$0xff] }
 0x2e0   : > { %v2313_v31 = vpop.f32.mrb[0].mxu1 }
 0x2e1   : > { %v2317_v4 = vpop.f32.mrb[1].mxu1 }
 0x2e2   : > { %v2319_v8 = vpop.f32.mrb[2].mxu1  ;;  %1077 = vmatprep.mubr.f32.mxu0 %v2317_v4  ;;  %1160 = vmatprep.mubr.f32.mxu1 %v2317_v4 }
 0x2e3   : > { %v2325_v58 = vpop.f32.mrb[3].mxu1  ;;  %1078 = vmatmul.mubr.f32.vlgmr.msra.gmra.mrb[32].mxu0 %v2313_v31  ;;  %1161 = vmatmul.mubr.f32.vlgmr.msra.gmra.mrb[8].mxu1 %v2313_v31 }
 0x2e4   : > { %1671 = vmatpush1.bf16.msra.mxu0 %v1670_v22  ;;  %1812 = vmatpush1.bf16.msra.mxu1 %v2315_v57  ;;  %v851_v22 = vld [vmem:[#allocation2 + $0x2f0] sm:$0xff] }
 0x2e5   : > { %1083 = vmatprep.mubr.f32.mxu0 %v2325_v58  ;;  %1166 = vmatprep.mubr.f32.mxu1 %v2325_v58 }
 0x2e6   : > { %1673 = vmatprep.subr.bf16.mxu0 %v1672_v36  ;;  %1797 = vmatprep.subr.bf16.mxu1 %v2323_v62  ;;  %v2368_v36 = vpack.c.bf16 %v851_v22, %v843_v45  ;;  %v2389_v45 = vpack.c.bf16 %v916_v42, %v908_v40  ;;  %v907_v22 = vld [vmem:[#allocation2 + $0x4b0] sm:$0xff]  ;;  %v961_v40 = vld [vmem:[#allocation2 + $0x660] sm:$0xff] }
 0x2e7   : > { %1084 = vmatmul.mubr.f32.gmra.mrb[34].mxu0 %v2319_v8  ;;  %1167 = vmatmul.mubr.f32.gmra.mrb[10].mxu1 %v2319_v8  ;;  %v2392_v10 = vpack.c.bf16 %v915_v60, %v907_v22  ;;  %v978_v22 = vld [vmem:[#allocation2 + $0x6e8] sm:$0xff]  ;;  %v972_v60 = vld [vmem:[#allocation2 + $0x6b8] sm:$0xff] }
 0x2e8   : > { %1675 = vmatpush1.bf16.msra.mxu0 %v1674_v15  ;;  %1813 = vmatpush1.bf16.msra.mxu1 %v2330_v9  ;;  %v2340_v16 = vpop.f32.mrb[4].mxu1  ;;  %v2371_v15 = vpack.c.bf16 %v868_v63, %v860_v61  ;;  %v930_v61 = vld [vmem:[#allocation2 + $0x568] sm:$0xff]  ;;  %v924_v63 = vld [vmem:[#allocation2 + $0x538] sm:$0xff] }
 0x2e9   : > { %v2344_v52 = vpop.f32.mrb[5].mxu1  ;;  %1677 = vmatprep.subr.bf16.mxu0 %v1676_v13  ;;  %1798 = vmatprep.subr.bf16.mxu1 %v2334_v50  ;;  %v867_v13 = vld [vmem:[#allocation2 + $0x370] sm:$0xff] }
 0x2ea   : > { %1089 = vmatprep.mubr.f32.mxu0 %v2344_v52  ;;  %1172 = vmatprep.mubr.f32.mxu1 %v2344_v52  ;;  %v754_v49 = vpop.f32.mrb[6].mxu1  ;;  %v2374_v34 = vpack.c.bf16 %v867_v13, %v859_v17  ;;  %v929_v17 = vld [vmem:[#allocation2 + $0x560] sm:$0xff]  ;;  %v1708_v13 = vpack.c.bf16 %v930_v61, %v922_v0  ;;  %v980_v0 = vld [vmem:[#allocation2 + $0x6f8] sm:$0xff] }
 0x2eb   : > { %1090 = vmatmul.mubr.f32.gmra.mrb[36].mxu0 %v2340_v16  ;;  %1173 = vmatmul.mubr.f32.gmra.mrb[12].mxu1 %v2340_v16  ;;  %v755_v37 = vpop.f32.mrb[7].mxu1  ;;  %v2380_v49 = vpack.c.bf16 %v883_v23, %v875_v41  ;;  %v2398_v41 = vpack.c.bf16 %v931_v56, %v923_v59  ;;  %v937_v23 = vld [vmem:[#allocation2 + $0x5a0] sm:$0xff]  ;;  %v979_v59 = vld [vmem:[#allocation2 + $0x6f0] sm:$0xff]  ;;  %v986_v56 = vld [vmem:[#allocation2 + $0x728] sm:$0xff] }
 0x2ec   : > { %1679 = vmatpush1.bf16.msra.mxu0 %v1678_v20  ;;  %1814 = vmatpush1.bf16.msra.mxu1 %v2342_v7  ;;  %v881_v20 = vld [vmem:[#allocation2 + $0x3e0] sm:$0xff] }
 0x2ed   : > { %1243 = vmatprep.mubr.f32.mxu0 %v2317_v4  ;;  %1332 = vmatprep.mubr.f32.mxu1 %v2325_v58  ;;  %v1698_v6 = vpack.c.bf16 %v881_v20, %v873_v21  ;;  %v889_v37 = vld [vmem:[#allocation2 + $0x420] sm:$0xff]  ;;  %v940_v21 = vld [vmem:[#allocation2 + $0x5b8] sm:$0xff] }
 0x2ee   : > { %1681 = vmatprep.subr.bf16.mxu0 %v1680_v25  ;;  %1799 = vmatprep.subr.bf16.mxu1 %v2349_v26  ;;  %v898_v25 = vld [vmem:[#allocation2 + $0x468] sm:$0xff]  ;;  %v948_v20 = vld [vmem:[#allocation2 + $0x5f8] sm:$0xff] }
 0x2ef   : > { %v1700_v33 = vpack.c.bf16 %v898_v25, %v890_v53  ;;  %v945_v53 = vld [vmem:[#allocation2 + $0x5e0] sm:$0xff]  ;;  %v2401_v27 = vpack.c.bf16 %v948_v20, %v940_v21  ;;  %v996_v21 = vld [vmem:[#allocation2 + $0x778] sm:$0xff] }
 0x2f0   : > { %1683 = vmatpush1.bf16.msra.mxu0 %v1682_v29  ;;  %1815 = vmatpush1.bf16.msra.mxu1 %v2354_v30  ;;  %v897_v29 = vld [vmem:[#allocation2 + $0x460] sm:$0xff] }
 0x2f1   : > { %1685 = vmatprep.subr.bf16.mxu0 %v1684_v43  ;;  %1800 = vmatprep.subr.bf16.mxu1 %v2358_v55  ;;  %v891_v43 = vld [vmem:[#allocation2 + $0x430] sm:$0xff]  ;;  %v1702_v44 = vpack.c.bf16 %v897_v29, %v889_v37  ;;  %v954_v37 = vld [vmem:[#allocation2 + $0x628] sm:$0xff] }
 0x2f2   : > { %v962_v29 = vld [vmem:[#allocation2 + $0x668] sm:$0xff] }
 0x2f3   : > { %v1716_v42 = vpack.c.bf16 %v962_v29, %v954_v37  ;;  %v995_v37 = vld [vmem:[#allocation2 + $0x770] sm:$0xff]  ;;  %v1002_v29 = vld [vmem:[#allocation2 + $0x7a8] sm:$0xff] }
 0x2f4   : > { %1687 = vmatpush1.bf16.msra.mxu0 %v1686_v14  ;;  %1816 = vmatpush1.bf16.msra.mxu1 %v2362_v46  ;;  %v2386_v14 = vpack.c.bf16 %v899_v24, %v891_v43  ;;  %v964_v43 = vld [vmem:[#allocation2 + $0x678] sm:$0xff]  ;;  %v1714_v24 = vpack.c.bf16 %v945_v53, %v937_v23  ;;  %v985_v23 = vld [vmem:[#allocation2 + $0x720] sm:$0xff] }
 0x2f5   : > { %1689 = vmatprep.subr.bf16.mxu0 %v1688_v54  ;;  %1801 = vmatprep.subr.bf16.mxu1 %v2365_v39  ;;  %v1704_v54 = vpack.c.bf16 %v914_v38, %v906_v18  ;;  %v953_v38 = vld [vmem:[#allocation2 + $0x620] sm:$0xff] }
 0x2f6   : > { %v1718_v61 = vpack.c.bf16 %v961_v40, %v953_v38  ;;  %v993_v53 = vld [vmem:[#allocation2 + $0x760] sm:$0xff] }
 0x2f7   : > { %v1726_v38 = vpack.c.bf16 %v993_v53, %v985_v23 }
 0x2f8   : > { %1691 = vmatpush1.bf16.msra.mxu0 %v1690_v3  ;;  %1817 = vmatpush1.bf16.msra.mxu1 %v2368_v36  ;;  %v932_v3 = vld [vmem:[#allocation2 + $0x578] sm:$0xff] }
 0x2f9   : > { %1693 = vmatprep.subr.bf16.mxu0 %v1692_v32  ;;  %1802 = vmatprep.subr.bf16.mxu1 %v2371_v15  ;;  %v921_v32 = vld [vmem:[#allocation2 + $0x520] sm:$0xff]  ;;  %v2395_v5 = vpack.c.bf16 %v932_v3, %v924_v63  ;;  %v2410_v63 = vpack.c.bf16 %v963_v51, %v955_v48 }
 0x2fa   : > { %v969_v3 = vld [vmem:[#allocation2 + $0x6a0] sm:$0xff] }
 0x2fc   : > { %1695 = vmatpush1.bf16.msra.mxu0 %v1694_v47  ;;  %1818 = vmatpush1.bf16.msra.mxu1 %v2374_v34  ;;  %v946_v47 = vld [vmem:[#allocation2 + $0x5e8] sm:$0xff] }
 0x2fd   : > { %1697 = vmatprep.subr.bf16.mxu0 %v1696_v11  ;;  %1803 = vmatprep.subr.bf16.mxu1 %v2377_v19  ;;  %v1710_v11 = vpack.c.bf16 %v929_v17, %v921_v32  ;;  %v1712_v25 = vpack.c.bf16 %v946_v47, %v938_v1  ;;  %v2413_v17 = vpack.c.bf16 %v980_v0, %v972_v60  ;;  %v994_v1 = vld [vmem:[#allocation2 + $0x768] sm:$0xff]  ;;  %v988_v47 = vld [vmem:[#allocation2 + $0x738] sm:$0xff]  ;;  %v1011_v60 = vld [vmem:[#allocation2 + $0x7f0] sm:$0xff] }
 0x300   : > { %1699 = vmatpush1.bf16.msra.mxu0 %v1698_v6  ;;  %1819 = vmatpush1.bf16.msra.mxu1 %v2380_v49  ;;  %v947_v6 = vld [vmem:[#allocation2 + $0x5f0] sm:$0xff] }
 0x301   : > { %1701 = vmatprep.subr.bf16.mxu0 %v1700_v33  ;;  %1804 = vmatprep.subr.bf16.mxu1 %v2383_v35  ;;  %v956_v33 = vld [vmem:[#allocation2 + $0x638] sm:$0xff]  ;;  %v2404_v18 = vpack.c.bf16 %v947_v6, %v939_v28  ;;  %v2419_v28 = vpack.c.bf16 %v996_v21, %v988_v47  ;;  %v987_v6 = vld [vmem:[#allocation2 + $0x730] sm:$0xff] }
 0x302   : > { %v1790_v40 = vpack.c.bf16 %v995_v37, %v987_v6 }
 0x304   : > { %1703 = vmatpush1.bf16.msra.mxu0 %v1702_v44  ;;  %1820 = vmatpush1.bf16.msra.mxu1 %v2386_v14  ;;  %v2407_v44 = vpack.c.bf16 %v964_v43, %v956_v33  ;;  %v1010_v33 = vld [vmem:[#allocation2 + $0x7e8] sm:$0xff]  ;;  %v1004_v43 = vld [vmem:[#allocation2 + $0x7b8] sm:$0xff] }
 0x305   : > { %1705 = vmatprep.subr.bf16.mxu0 %v1704_v54  ;;  %1805 = vmatprep.subr.bf16.mxu1 %v2389_v45  ;;  %v970_v54 = vld [vmem:[#allocation2 + $0x6a8] sm:$0xff]  ;;  %v1728_v48 = vpack.c.bf16 %v1010_v33, %v1002_v29 }
 0x306   : > { %v1720_v32 = vpack.c.bf16 %v978_v22, %v970_v54  ;;  %v1009_v54 = vld [vmem:[#allocation2 + $0x7e0] sm:$0xff]  ;;  %v1003_v22 = vld [vmem:[#allocation2 + $0x7b0] sm:$0xff] }
 0x308   : > { %1707 = vmatpush1.bf16.msra.mxu0 %v1706_v12  ;;  %1821 = vmatpush1.bf16.msra.mxu1 %v2392_v10  ;;  %v977_v12 = vld [vmem:[#allocation2 + $0x6e0] sm:$0xff] }
 0x309   : > { %1709 = vmatprep.subr.bf16.mxu0 %v1708_v13  ;;  %1806 = vmatprep.subr.bf16.mxu1 %v2395_v5  ;;  %v971_v13 = vld [vmem:[#allocation2 + $0x6b0] sm:$0xff]  ;;  %v1722_v20 = vpack.c.bf16 %v977_v12, %v969_v3 }
 0x30c   : > { %1711 = vmatpush1.bf16.msra.mxu0 %v1710_v11  ;;  %1822 = vmatpush1.bf16.msra.mxu1 %v2398_v41  ;;  %v2416_v11 = vpack.c.bf16 %v979_v59, %v971_v13 }
 0x30d   : > { %1713 = vmatprep.subr.bf16.mxu0 %v1712_v25  ;;  %1807 = vmatprep.subr.bf16.mxu1 %v2401_v27  ;;  %v1724_v25 = vpack.c.bf16 %v994_v1, %v986_v56 }
 0x310   : > { %1715 = vmatpush1.bf16.msra.mxu0 %v1714_v24  ;;  %1823 = vmatpush1.bf16.msra.mxu1 %v2404_v18  ;;  %v1012_v24 = vld [vmem:[#allocation2 + $0x7f8] sm:$0xff] }
 0x311   : > { %1717 = vmatprep.subr.bf16.mxu0 %v1716_v42  ;;  %1808 = vmatprep.subr.bf16.mxu1 %v2407_v44  ;;  %v1001_v42 = vld [vmem:[#allocation2 + $0x7a0] sm:$0xff]  ;;  %v1792_v51 = vpack.c.bf16 %v1012_v24, %v1004_v43 }
 0x312   : > { %v1730_v0 = vpack.c.bf16 %v1009_v54, %v1001_v42 }
 0x314   : > { %1719 = vmatpush1.bf16.msra.mxu0 %v1718_v61  ;;  %1824 = vmatpush1.bf16.msra.mxu1 %v2410_v63  ;;  %v1794_v61 = vpack.c.bf16 %v1011_v60, %v1003_v22 }
 0x315   : > { %1721 = vmatprep.subr.bf16.mxu0 %v1720_v32  ;;  %1809 = vmatprep.subr.bf16.mxu1 %v2413_v17 }
 0x318   : > { %1723 = vmatpush1.bf16.msra.mxu0 %v1722_v20  ;;  %1825 = vmatpush1.bf16.msra.mxu1 %v2416_v11 }
 0x319   : > { %1725 = vmatprep.subr.bf16.mxu0 %v1724_v25  ;;  %1810 = vmatprep.subr.bf16.mxu1 %v2419_v28 }
 0x31c   : > { %1727 = vmatpush1.bf16.msra.mxu0 %v1726_v38  ;;  %1826 = vmatpush1.bf16.msra.mxu1 %v1790_v40 }
 0x31d   : > { %1729 = vmatprep.subr.bf16.mxu0 %v1728_v48  ;;  %1811 = vmatprep.subr.bf16.mxu1 %v1792_v51 }
 0x320   : > { %1731 = vmatpush1.bf16.msra.mxu0 %v1730_v0  ;;  %1827 = vmatpush1.bf16.msra.mxu1 %v1794_v61 }
 0x321   : > { %1733 = vmatprep.subr.bf16.mxu0 %v2310_v2 }
 0x323   : > { %1244 = vmatmul.mubr.f32.vlgmr.msra.gmra.mrb[38].mxu0 %v2313_v31  ;;  %1333 = vmatmul.mubr.f32.vlgmr.msra.gmra.mrb[14].mxu1 %v2319_v8 }
 0x324   : > { %1249 = vmatprep.mubr.f32.mxu0 %v2325_v58  ;;  %1735 = vmatpush1.bf16.msra.mxu0 %v2315_v57 }
 0x325   : > { %1338 = vmatprep.mubr.f32.mxu1 %v2344_v52  ;;  %1737 = vmatprep.subr.bf16.mxu0 %v2323_v62 }
 0x327   : > { %1250 = vmatmul.mubr.f32.gmra.mrb[40].mxu0 %v2319_v8  ;;  %1339 = vmatmul.mubr.f32.gmra.mrb[16].mxu1 %v2340_v16 }
 0x328   : > { %1255 = vmatprep.mubr.f32.mxu0 %v2344_v52  ;;  %1739 = vmatpush1.bf16.msra.mxu0 %v2330_v9 }
 0x329   : > { %1741 = vmatprep.subr.bf16.mxu0 %v2334_v50 }
 0x32b   : > { %1256 = vmatmul.mubr.f32.gmra.mrb[42].mxu0 %v2340_v16 }
 0x32c   : > { %1743 = vmatpush1.bf16.msra.mxu0 %v2342_v7  ;;  %1326 = vmatprep.mubr.f32.mxu0 %v2317_v4 }
 0x32d   : > { %1745 = vmatprep.subr.bf16.mxu0 %v2349_v26 }
 0x330   : > { %1747 = vmatpush1.bf16.msra.mxu0 %v2354_v30 }
 0x331   : > { %1749 = vmatprep.subr.bf16.mxu0 %v2358_v55 }
 0x334   : > { %1751 = vmatpush1.bf16.msra.mxu0 %v2362_v46 }
 0x335   : > { %1753 = vmatprep.subr.bf16.mxu0 %v2365_v39 }
 0x338   : > { %1755 = vmatpush1.bf16.msra.mxu0 %v2368_v36 }
 0x339   : > { %1757 = vmatprep.subr.bf16.mxu0 %v2371_v15 }
 0x33c   : > { %1759 = vmatpush1.bf16.msra.mxu0 %v2374_v34 }
 0x33d   : > { %1761 = vmatprep.subr.bf16.mxu0 %v2377_v19 }
 0x340   : > { %1763 = vmatpush1.bf16.msra.mxu0 %v2380_v49 }
 0x341   : > { %1765 = vmatprep.subr.bf16.mxu0 %v2383_v35 }
 0x344   : > { %1767 = vmatpush1.bf16.msra.mxu0 %v2386_v14 }
 0x345   : > { %1769 = vmatprep.subr.bf16.mxu0 %v2389_v45 }
 0x348   : > { %1771 = vmatpush1.bf16.msra.mxu0 %v2392_v10 }
 0x349   : > { %1773 = vmatprep.subr.bf16.mxu0 %v2395_v5 }
 0x34c   : > { %1775 = vmatpush1.bf16.msra.mxu0 %v2398_v41 }
 0x34d   : > { %1777 = vmatprep.subr.bf16.mxu0 %v2401_v27 }
 0x350   : > { %1779 = vmatpush1.bf16.msra.mxu0 %v2404_v18 }
 0x351   : > { %1781 = vmatprep.subr.bf16.mxu0 %v2407_v44 }
 0x354   : > { %1783 = vmatpush1.bf16.msra.mxu0 %v2410_v63 }
 0x355   : > { %1785 = vmatprep.subr.bf16.mxu0 %v2413_v17 }
 0x358   : > { %1787 = vmatpush1.bf16.msra.mxu0 %v2416_v11 }
 0x359   : > { %1789 = vmatprep.subr.bf16.mxu0 %v2419_v28 }
 0x35c   : > { %1791 = vmatpush1.bf16.msra.mxu0 %v1790_v40 }
 0x35d   : > { %1793 = vmatprep.subr.bf16.mxu0 %v1792_v51 }
 0x360   : > { %1795 = vmatpush1.bf16.msra.mxu0 %v1794_v61 }
 0x363   : > { %1327 = vmatmul.mubr.f32.vlgmr.msra.gmra.mrb[44].mxu0 %v2313_v31 }
 0x3b6   : > { %v1079_v2 = vpop.f32.mrb[32].mxu0  ;;  %v1162_v57 = vpop.f32.mrb[8].mxu1 }
 0x3b7   : > { %1345 = vst [vmem:[%s2466_s28] sm:$0xff] %v1079_v2  ;;  %1347 = vst [vmem:[%s2466_s28 + $0x10] sm:$0xff] %v1162_v57  ;;  %v1081_v31 = vpop.f32.mrb[33].mxu0  ;;  %v1164_v4 = vpop.f32.mrb[9].mxu1 }
 0x3b8   : > { %1346 = vst [vmem:[%s2466_s28 + $0x8] sm:$0xff] %v1081_v31  ;;  %1348 = vst [vmem:[%s2466_s28 + $0x18] sm:$0xff] %v1164_v4 }
 0x3ba   : > { %v1085_v8 = vpop.f32.mrb[34].mxu0  ;;  %v1168_v62 = vpop.f32.mrb[10].mxu1 }
 0x3bb   : > { %1353 = vst [vmem:[%s2466_s28 + $0x40] sm:$0xff] %v1085_v8  ;;  %1355 = vst [vmem:[%s2466_s28 + $0x50] sm:$0xff] %v1168_v62  ;;  %v1087_v58 = vpop.f32.mrb[35].mxu0  ;;  %v1170_v9 = vpop.f32.mrb[11].mxu1 }
 0x3bc   : > { %1354 = vst [vmem:[%s2466_s28 + $0x48] sm:$0xff] %v1087_v58  ;;  %1356 = vst [vmem:[%s2466_s28 + $0x58] sm:$0xff] %v1170_v9 }
 0x3be   : > { %v1091_v50 = vpop.f32.mrb[36].mxu0  ;;  %v1174_v16 = vpop.f32.mrb[12].mxu1 }
 0x3bf   : > { %1361 = vst [vmem:[%s2466_s28 + $0x80] sm:$0xf] %v1091_v50  ;;  %1363 = vst [vmem:[%s2466_s28 + $0x90] sm:$0xf] %v1174_v16  ;;  %v1093_v7 = vpop.f32.mrb[37].mxu0  ;;  %v1176_v52 = vpop.f32.mrb[13].mxu1 }
 0x3c0   : > { %1362 = vst [vmem:[%s2466_s28 + $0x88] sm:$0xf] %v1093_v7  ;;  %1364 = vst [vmem:[%s2466_s28 + $0x98] sm:$0xf] %v1176_v52 }
 0x3f6   : > { %v1245_v26 = vpop.f32.mrb[38].mxu0  ;;  %v1334_v30 = vpop.f32.mrb[14].mxu1 }
 0x3f7   : > { %1349 = vst [vmem:[%s2466_s28 + $0x20] sm:$0xff] %v1245_v26  ;;  %1359 = vst [vmem:[%s2466_s28 + $0x70] sm:$0xff] %v1334_v30  ;;  %v1247_v55 = vpop.f32.mrb[39].mxu0  ;;  %v1336_v46 = vpop.f32.mrb[15].mxu1 }
 0x3f8   : > { %1350 = vst [vmem:[%s2466_s28 + $0x28] sm:$0xff] %v1247_v55  ;;  %1360 = vst [vmem:[%s2466_s28 + $0x78] sm:$0xff] %v1336_v46 }
 0x3fa   : > { %v1251_v39 = vpop.f32.mrb[40].mxu0  ;;  %v1340_v36 = vpop.f32.mrb[16].mxu1 }
 0x3fb   : > { %1357 = vst [vmem:[%s2466_s28 + $0x60] sm:$0xff] %v1251_v39  ;;  %1367 = vst [vmem:[%s2466_s28 + $0xb0] sm:$0xf] %v1340_v36  ;;  %v1253_v15 = vpop.f32.mrb[41].mxu0  ;;  %v1342_v34 = vpop.f32.mrb[17].mxu1 }
 0x3fc   : > { %1358 = vst [vmem:[%s2466_s28 + $0x68] sm:$0xff] %v1253_v15  ;;  %1368 = vst [vmem:[%s2466_s28 + $0xb8] sm:$0xf] %v1342_v34 }
 0x3fe   : > { %v1257_v19 = vpop.f32.mrb[42].mxu0 }
 0x3ff   : > { %1365 = vst [vmem:[%s2466_s28 + $0xa0] sm:$0xf] %v1257_v19  ;;  %v1259_v49 = vpop.f32.mrb[43].mxu0 }
 0x400   : > { %1366 = vst [vmem:[%s2466_s28 + $0xa8] sm:$0xf] %v1259_v49 }
 0x436   : > { %v1328_v35 = vpop.f32.mrb[44].mxu0 }
 0x437   : > { %1351 = vst [vmem:[%s2466_s28 + $0x30] sm:$0xff] %v1328_v35  ;;  %v1330_v14 = vpop.f32.mrb[45].mxu0 }
 0x438   : > { %1352 = vst [vmem:[%s2466_s28 + $0x38] sm:$0xff] %v1330_v14 }
 0x439 PF: > { %s16_s18 = sadd.s32 1, %s1956_s18  }
 0x43a   : > { %p13_p3 = scmp.ge.s32.totalorder %s16_s18, 4  }
 0x43c   :  { %15 = sbr.rel (!%p13_p3) target bundleno = 1 (0x1), region = 75 }
 0x443   :  { %1390 = vsyncpa [#allocation3], 1 }
 0x444   :  { %1392 = vsyncpa [#allocation3 + $0x1], 1 }

</bundles_post_ra>
